<compile_context>
chip_gen: v6e
topology: v6e:2x2x1
jax: 0.10.0
libtpu: 0.0.40
codegen_flags: <defaults>
</compile_context>

<pallas_src>
import functools

import jax
import jax.numpy as jnp
from jax import lax
from jax.experimental import pallas as pl
from jax.experimental.pallas import tpu as pltpu


def _round_up(x: int, m: int) -> int:
    return ((x + m - 1) // m) * m


def gn_block_kernel(
    x_e_ref,     # (TE, F_cat_p) cdt   concat[e, v[src], v[dst]] for this edge tile
    dst_ref,     # (1, TE) int32       dst node id per edge (padded edges -> N_p)
    v_ref,       # (N_p, F_v_p) cdt    node attributes (resident across tiles)
    we_ref,      # (F_cat_p, H_e_p) cdt      fused phi_e weight [We; Wvs; Wvd]
    be_ref,      # (1, H_e_p) f32            fused phi_e bias (u @ Weu + be)
    wv_ref,      # (H_e_p+F_v_p, H_v_p) cdt  fused phi_v weight [Wbe; Wv]
    bv_ref,      # (1, H_v_p) f32            fused phi_v bias (u @ Wvu + bv)
    wu_ref,      # (H_e_p+H_v_p, H_u_p) cdt  fused phi_u weight [Wue; Wuv]
    bu_ref,      # (1, H_u_p) f32            fused phi_u bias (u @ Wuu + bu)
    ep_out_ref,  # (TE, H_e_p) cdt
    vp_out_ref,  # (N_p, H_v_p) f32
    up_out_ref,  # (1, H_u_p) f32
    b_ei_acc,    # VMEM (N_p, H_e_p) f32  scatter-sum accumulator
    e_sum_acc,   # VMEM (1, H_e_p)  f32   running sum of e_p rows (incl. pad rows)
    *, n_nodes: int, n_edges: int, n_pad_edges: int,
):
    f32 = jnp.float32
    cdt = we_ref.dtype
    t = pl.program_id(0)
    nsteps = pl.num_programs(0)
    tile_e = x_e_ref.shape[0]
    n_pad, h_e_p = b_ei_acc.shape
    f_v_p = v_ref.shape[1]
    h_v_p = vp_out_ref.shape[1]

    @pl.when(t == 0)
    def _init():
        b_ei_acc[...] = jnp.zeros_like(b_ei_acc)
        e_sum_acc[...] = jnp.zeros_like(e_sum_acc)

    # ---- phi_e: one fused wide-K matmul (u term + bias pre-folded into be) ----
    e_p = jnp.maximum(
        jnp.dot(x_e_ref[...], we_ref[...], preferred_element_type=f32) + be_ref[...],
        0.0)                                                        # (TE, H_e_p) f32
    ep_out_ref[...] = e_p.astype(ep_out_ref.dtype)

    # ---- rho_e_v (scatter-sum to dst) + rho_e_u (running sum) ----------------
    # One-hot built in the compute dtype so the MXU runs natively (exact 0/1
    # values in bf16); f32 accumulation kept.  Padded edges have dst == N_p
    # (never matches the iota) so no per-tile edge mask is needed.
    node_ids = lax.broadcasted_iota(jnp.int32, (n_pad, tile_e), 0)
    scat_t = (node_ids == dst_ref[...]).astype(cdt)                 # (N_p, TE)
    b_ei_acc[...] += jnp.dot(scat_t, e_p.astype(cdt), preferred_element_type=f32)
    e_sum_acc[...] += jnp.sum(e_p, axis=0, keepdims=True)

    # ---- finalize on the last edge tile: phi_v, rho_*_u, phi_u ---------------
    @pl.when(t == nsteps - 1)
    def _finalize():
        # phi_v as two dots against static weight-ref slices (no concat temp).
        v_pre = (jnp.dot(b_ei_acc[...].astype(cdt), wv_ref[pl.ds(0, h_e_p), :],
                         preferred_element_type=f32)
                 + jnp.dot(v_ref[...], wv_ref[pl.ds(h_e_p, f_v_p), :],
                           preferred_element_type=f32)
                 + bv_ref[...])
        v_p = jnp.maximum(v_pre, 0.0)
        nidx = lax.broadcasted_iota(jnp.int32, (n_pad, 1), 0)
        v_p = jnp.where(nidx < n_nodes, v_p, 0.0)                   # mask pad nodes
        vp_out_ref[...] = v_p.astype(vp_out_ref.dtype)

        # Means with static reciprocals.  Padded edge rows contributed exactly
        # relu(be) each (their x_e rows are exactly zero) -> subtract once.
        e_sum = e_sum_acc[...]
        if n_pad_edges > 0:
            e_sum = e_sum - float(n_pad_edges) * jnp.maximum(be_ref[...], 0.0)
        b_e_u = e_sum * (1.0 / n_edges)                             # (1, H_e_p)
        b_v_u = jnp.sum(v_p, axis=0, keepdims=True) * (1.0 / n_nodes)

        u_pre = (jnp.dot(b_e_u.astype(cdt), wu_ref[pl.ds(0, h_e_p), :],
                         preferred_element_type=f32)
                 + jnp.dot(b_v_u.astype(cdt), wu_ref[pl.ds(h_e_p, h_v_p), :],
                           preferred_element_type=f32)
                 + bu_ref[...])
        up_out_ref[...] = jnp.maximum(u_pre, 0.0).astype(up_out_ref.dtype)


def gn_block(edge_attr, node_attr, u, edge_index, params, *,
             tile_e=512, compute_dtype=jnp.float32):
    """Runs one GN block. edge_index is (src, dst) int arrays of length E."""
    E, F_e = edge_attr.shape
    N, F_v = node_attr.shape
    assert E > 0 and N > 0, "empty graphs are not supported"
    src, dst = edge_index

    (we_e, we_vs, we_vd, we_u, be,
     wv_be, wv_v, wv_u, bv,
     wu_e, wu_v, wu_u, bu) = params
    H_e, H_v, H_u = we_e.shape[1], wv_v.shape[1], wu_u.shape[1]

    f32 = jnp.float32
    cdt = compute_dtype

    # Lane-dense padded sizes (multiples of 128 on the feature/lane axis).
    H_e_p, H_v_p, H_u_p = (_round_up(h, 128) for h in (H_e, H_v, H_u))
    F_v_p = _round_up(F_v, 128)
    F_cat = F_e + 2 * F_v
    F_cat_p = _round_up(F_cat, 128)
    N_p = _round_up(N, 8)

    # Edge tiling: TE is a multiple of 128 so all BlockSpecs are (8,128)-aligned.
    TE = min(_round_up(E, 128), _round_up(tile_e, 128))
    E_p = _round_up(E, TE)
    num_tiles = E_p // TE
    n_pad_edges = E_p - E

    # --- neighbour gather in plain JAX (O(E*F_v) data movement, no one-hot
    #     matmuls), then build the concatenated phi_e activation.
    x_e = jnp.concatenate([edge_attr, node_attr[src], node_attr[dst]], axis=1)
    x_e = jnp.pad(x_e, ((0, E_p - E), (0, F_cat_p - F_cat))).astype(cdt)
    # Padded edges get dst = N_p (out of range) -> zero one-hot column in kernel.
    dst_row = jnp.pad(dst.astype(jnp.int32), (0, E_p - E),
                      constant_values=N_p).reshape(1, E_p)
    v_pad = jnp.pad(node_attr, ((0, N_p - N), (0, F_v_p - F_v))).astype(cdt)

    # --- fuse per-update weights (stack along K), fold u-term + bias into one row.
    we_cat = jnp.pad(jnp.concatenate([we_e, we_vs, we_vd], axis=0),
                     ((0, F_cat_p - F_cat), (0, H_e_p - H_e))).astype(cdt)
    be_row = jnp.pad(u @ we_u + be, ((0, 0), (0, H_e_p - H_e))).astype(f32)

    wv_cat = jnp.concatenate([jnp.pad(wv_be, ((0, H_e_p - H_e), (0, 0))),
                              jnp.pad(wv_v,  ((0, F_v_p - F_v), (0, 0)))], axis=0)
    wv_cat = jnp.pad(wv_cat, ((0, 0), (0, H_v_p - H_v))).astype(cdt)
    bv_row = jnp.pad(u @ wv_u + bv, ((0, 0), (0, H_v_p - H_v))).astype(f32)

    wu_cat = jnp.concatenate([jnp.pad(wu_e, ((0, H_e_p - H_e), (0, 0))),
                              jnp.pad(wu_v, ((0, H_v_p - H_v), (0, 0)))], axis=0)
    wu_cat = jnp.pad(wu_cat, ((0, 0), (0, H_u_p - H_u))).astype(cdt)
    bu_row = jnp.pad(u @ wu_u + bu, ((0, 0), (0, H_u_p - H_u))).astype(f32)

    kernel = functools.partial(gn_block_kernel, n_nodes=N, n_edges=E,
                               n_pad_edges=n_pad_edges)

    # Explicit scoped-VMEM budget (defaults are only 16/32 MiB).
    itemsize = jnp.dtype(cdt).itemsize
    streamed = 2 * (TE * F_cat_p * itemsize + TE * H_e_p * itemsize + TE * 4)
    resident = 2 * (N_p * F_v_p * itemsize
                    + (F_cat_p * H_e_p + (H_e_p + F_v_p) * H_v_p
                       + (H_e_p + H_v_p) * H_u_p) * itemsize
                    + (H_e_p + H_v_p + H_u_p) * 4
                    + (N_p * H_v_p + H_u_p) * 4)
    scratch = (N_p * H_e_p + H_e_p) * 4
    vmem_limit = int(min(max(2 * (streamed + resident + scratch) + (8 << 20),
                             32 << 20), 120 << 20))

    edge_tiled = lambda t: (t, 0)
    row_tiled = lambda t: (0, t)
    whole = lambda t: (0, 0)

    def _call(single_buffer_consts):
        # Constant-index operands don't benefit from double buffering; request
        # a single buffer to halve their VMEM footprint (fallback if the
        # installed Pallas rejects pipeline_mode).
        if single_buffer_consts:
            const_kw = dict(pipeline_mode=pl.Buffered(1))
        else:
            const_kw = {}
        in_specs = [
            pl.BlockSpec((TE, F_cat_p), edge_tiled),                 # x_e (streamed)
            pl.BlockSpec((1, TE), row_tiled),                        # dst indices
            pl.BlockSpec((N_p, F_v_p), whole, **const_kw),           # node attrs
            pl.BlockSpec((F_cat_p, H_e_p), whole, **const_kw),       # fused weights
            pl.BlockSpec((1, H_e_p), whole, **const_kw),
            pl.BlockSpec((H_e_p + F_v_p, H_v_p), whole, **const_kw),
            pl.BlockSpec((1, H_v_p), whole, **const_kw),
            pl.BlockSpec((H_e_p + H_v_p, H_u_p), whole, **const_kw),
            pl.BlockSpec((1, H_u_p), whole, **const_kw),
        ]
        out_specs = [
            pl.BlockSpec((TE, H_e_p), edge_tiled),                   # e_p (streamed)
            pl.BlockSpec((N_p, H_v_p), whole, **const_kw),           # v_p (last step)
            pl.BlockSpec((1, H_u_p), whole, **const_kw),             # u_p (last step)
        ]
        grid_spec = pltpu.PrefetchScalarGridSpec(
            num_scalar_prefetch=0,
            grid=(num_tiles,),
            in_specs=in_specs,
            out_specs=out_specs,
            scratch_shapes=[pltpu.VMEM((N_p, H_e_p), f32),   # scatter-sum acc
                            pltpu.VMEM((1, H_e_p), f32)],    # e_p running sum
        )
        return pl.pallas_call(
            kernel,
            out_shape=(
                jax.ShapeDtypeStruct((E_p, H_e_p), cdt),     # e_p streams in cdt
                jax.ShapeDtypeStruct((N_p, H_v_p), f32),
                jax.ShapeDtypeStruct((1, H_u_p), f32),
            ),
            grid_spec=grid_spec,
            compiler_params=pltpu.CompilerParams(
                dimension_semantics=("arbitrary",),          # accumulators carried
                vmem_limit_bytes=vmem_limit),
        )(x_e, dst_row, v_pad, we_cat, be_row, wv_cat, bv_row, wu_cat, bu_row)

    try:
        e_p, v_p, u_p = _call(True)
    except Exception:
        e_p, v_p, u_p = _call(False)

    return e_p[:E, :H_e], v_p[:N, :H_v], u_p[:, :H_u]


def _reference(edge_attr, node_attr, u, edge_index, params):
    """Pure-JAX reference for correctness checking."""
    src, dst = edge_index
    (we_e, we_vs, we_vd, we_u, be,
     wv_be, wv_v, wv_u, bv,
     wu_e, wu_v, wu_u, bu) = params
    N = node_attr.shape[0]
    e_p = jax.nn.relu(edge_attr @ we_e + node_attr[src] @ we_vs
                      + node_attr[dst] @ we_vd + u @ we_u + be)
    b_ei = jnp.zeros((N, e_p.shape[1]), jnp.float32).at[dst].add(e_p)
    v_p = jax.nn.relu(b_ei @ wv_be + node_attr @ wv_v + u @ wv_u + bv)
    b_e_u = jnp.mean(e_p, axis=0, keepdims=True)
    b_v_u = jnp.mean(v_p, axis=0, keepdims=True)
    u_p = jax.nn.relu(b_e_u @ wu_e + b_v_u @ wu_v + u @ wu_u + bu)
    return e_p, v_p, u_p


def _glorot(key, shape):
    fan_in, fan_out = shape
    lim = (6.0 / (fan_in + fan_out)) ** 0.5
    return jax.random.uniform(key, shape, jnp.float32, -lim, lim)


def _make_case(key, N, E, F_v, F_e, F_u, H_e, H_v, H_u):
    ks = jax.random.split(key, 16)
    node_attr = jax.random.normal(ks[0], (N, F_v), jnp.float32)
    edge_attr = jax.random.normal(ks[1], (E, F_e), jnp.float32)
    u = jax.random.normal(ks[2], (1, F_u), jnp.float32)
    idx = jnp.arange(E)
    src = (idx % N).astype(jnp.int32)
    dst = ((3 * idx + 1) % N).astype(jnp.int32)
    params = (
        _glorot(ks[3], (F_e, H_e)), _glorot(ks[4], (F_v, H_e)),
        _glorot(ks[5], (F_v, H_e)), _glorot(ks[6], (F_u, H_e)),
        0.1 * jax.random.normal(ks[7], (1, H_e), jnp.float32),
        _glorot(ks[8], (H_e, H_v)), _glorot(ks[9], (F_v, H_v)),
        _glorot(ks[10], (F_u, H_v)),
        0.1 * jax.random.normal(ks[11], (1, H_v), jnp.float32),
        _glorot(ks[12], (H_e, H_u)), _glorot(ks[13], (H_v, H_u)),
        _glorot(ks[14], (F_u, H_u)),
        0.1 * jax.random.normal(ks[15], (1, H_u), jnp.float32),
    )
    return edge_attr, node_attr, u, (src, dst), params


if __name__ == "__main__":
    key = jax.random.PRNGKey(0)
    k1, k2, k3 = jax.random.split(key, 3)

    cases = [
        # (key, N,  E,   F_v, F_e, F_u, H_e, H_v, H_u, tile_e, compute_dtype, tol)
        (k1,    8,  16,  16,  16,  16,  32,  32,  32,  256, jnp.float32, 1e-4),
        (k2,   64,  300, 16,  16,  16,  32,  32,  32,  128, jnp.float32, 1e-4),
        (k3,   64,  300, 16,  16,  16,  32,  32,  32,  128, jnp.bfloat16, 2e-1),
    ]
    for (ck, N, E, F_v, F_e, F_u, H_e, H_v, H_u, tile_e, cdt, tol) in cases:
        edge_attr, node_attr, u_state, edge_index, params = _make_case(
            ck, N, E, F_v, F_e, F_u, H_e, H_v, H_u)

        outs = gn_block(edge_attr, node_attr, u_state, edge_index, params,
                        tile_e=tile_e, compute_dtype=cdt)
        outs = jax.block_until_ready(outs)

        refs = _reference(edge_attr, node_attr, u_state, edge_index, params)
        for o, r in zip(outs, refs):
            assert o.shape == r.shape, (o.shape, r.shape)
            o32 = jnp.asarray(o, jnp.float32)
            err = float(jnp.max(jnp.abs(o32 - r)))
            assert jnp.allclose(o32, r, atol=tol, rtol=tol), err

    print("KERNEL_OK")
</pallas_src>

<mosaic_0001>
module attributes {stable_mosaic.version = 11 : i64} {
  func.func @gn_block_kernel(%arg0: i32, %arg1: memref<128x128xf32, #tpu.memory_space<vmem>>, %arg2: memref<1x128xi32, #tpu.memory_space<vmem>>, %arg3: memref<8x128xf32, #tpu.memory_space<vmem>>, %arg4: memref<128x128xf32, #tpu.memory_space<vmem>>, %arg5: memref<1x128xf32, #tpu.memory_space<vmem>>, %arg6: memref<256x128xf32, #tpu.memory_space<vmem>>, %arg7: memref<1x128xf32, #tpu.memory_space<vmem>>, %arg8: memref<256x128xf32, #tpu.memory_space<vmem>>, %arg9: memref<1x128xf32, #tpu.memory_space<vmem>>, %arg10: memref<128x128xf32, #tpu.memory_space<vmem>>, %arg11: memref<8x128xf32, #tpu.memory_space<vmem>>, %arg12: memref<1x128xf32, #tpu.memory_space<vmem>>, %arg13: memref<8x128xf32, #tpu.memory_space<vmem>>, %arg14: memref<1x128xf32, #tpu.memory_space<vmem>>) attributes {dimension_semantics = [#tpu.dimension_semantics<arbitrary>], iteration_bounds = array<i64: 1>, scalar_prefetch = 0 : i64, scratch_operands = 2 : i64, tpu.core_type = #tpu.core_type<tc>, window_params = [{transform_indices = @transform_0, window_bounds = array<i64: 128, 128>}, {transform_indices = @transform_1, window_bounds = array<i64: 1, 128>}, {pipeline_mode = #tpu.pipeline_mode<synchronous>, transform_indices = @transform_2, window_bounds = array<i64: 8, 128>}, {pipeline_mode = #tpu.pipeline_mode<synchronous>, transform_indices = @transform_3, window_bounds = array<i64: 128, 128>}, {pipeline_mode = #tpu.pipeline_mode<synchronous>, transform_indices = @transform_4, window_bounds = array<i64: 1, 128>}, {pipeline_mode = #tpu.pipeline_mode<synchronous>, transform_indices = @transform_5, window_bounds = array<i64: 256, 128>}, {pipeline_mode = #tpu.pipeline_mode<synchronous>, transform_indices = @transform_6, window_bounds = array<i64: 1, 128>}, {pipeline_mode = #tpu.pipeline_mode<synchronous>, transform_indices = @transform_7, window_bounds = array<i64: 256, 128>}, {pipeline_mode = #tpu.pipeline_mode<synchronous>, transform_indices = @transform_8, window_bounds = array<i64: 1, 128>}, {transform_indices = @transform_9, window_bounds = array<i64: 128, 128>}, {pipeline_mode = #tpu.pipeline_mode<synchronous>, transform_indices = @transform_10, window_bounds = array<i64: 8, 128>}, {pipeline_mode = #tpu.pipeline_mode<synchronous>, transform_indices = @transform_11, window_bounds = array<i64: 1, 128>}]} {
    %c0_i32 = arith.constant 0 : i32
    %0 = arith.cmpi eq, %arg0, %c0_i32 : i32
    %1 = arith.extui %0 : i1 to i32
    %c0_i32_0 = arith.constant 0 : i32
    %2 = arith.cmpi ne, %1, %c0_i32_0 : i32
    scf.if %2 {
      %cst_23 = arith.constant 0.000000e+00 : f32
      %30 = vector.broadcast %cst_23 : f32 to vector<8x128xf32>
      %c0_24 = arith.constant 0 : index
      %c0_25 = arith.constant 0 : index
      %31 = vector.load %arg13[%c0_24, %c0_25] : memref<8x128xf32, #tpu.memory_space<vmem>>, vector<8x128xf32>
      tpu.vector_store %arg13[%c0_24, %c0_25], %30 {strides = array<i32>} : memref<8x128xf32, #tpu.memory_space<vmem>>, vector<8x128xf32>,
      %cst_26 = arith.constant 0.000000e+00 : f32
      %32 = vector.broadcast %cst_26 : f32 to vector<1x128xf32>
      %c0_27 = arith.constant 0 : index
      %c0_28 = arith.constant 0 : index
      %33 = vector.load %arg14[%c0_27, %c0_28] : memref<1x128xf32, #tpu.memory_space<vmem>>, vector<1x128xf32>
      tpu.vector_store %arg14[%c0_27, %c0_28], %32 {strides = array<i32>} : memref<1x128xf32, #tpu.memory_space<vmem>>, vector<1x128xf32>,
    } else {
    }
    %c0 = arith.constant 0 : index
    %c0_1 = arith.constant 0 : index
    %3 = vector.load %arg1[%c0, %c0_1] : memref<128x128xf32, #tpu.memory_space<vmem>>, vector<128x128xf32>
    %c0_2 = arith.constant 0 : index
    %c0_3 = arith.constant 0 : index
    %4 = vector.load %arg4[%c0_2, %c0_3] : memref<128x128xf32, #tpu.memory_space<vmem>>, vector<128x128xf32>
    %cst = arith.constant dense<0.000000e+00> : vector<128x128xf32>
    %5 = tpu.matmul %3, %4, %cst {dimension_numbers = #tpu.dot_dimension_numbers<[1], [0], [0], [1], [0, 0, 1, 1], [], []>} : vector<128x128xf32>, vector<128x128xf32>, vector<128x128xf32> -> vector<128x128xf32>
    %c0_4 = arith.constant 0 : index
    %c0_5 = arith.constant 0 : index
    %6 = vector.load %arg5[%c0_4, %c0_5] : memref<1x128xf32, #tpu.memory_space<vmem>>, vector<1x128xf32>
    %7 = vector.broadcast %6 : vector<1x128xf32> to vector<128x128xf32>
    %8 = arith.addf %5, %7 : vector<128x128xf32>
    %cst_6 = arith.constant 0.000000e+00 : f32
    %9 = vector.broadcast %cst_6 : f32 to vector<128x128xf32>
    %10 = arith.maximumf %8, %9 : vector<128x128xf32>
    %c0_7 = arith.constant 0 : index
    %c0_8 = arith.constant 0 : index
    %11 = vector.load %arg10[%c0_7, %c0_8] : memref<128x128xf32, #tpu.memory_space<vmem>>, vector<128x128xf32>
    tpu.vector_store %arg10[%c0_7, %c0_8], %10 {strides = array<i32>} : memref<128x128xf32, #tpu.memory_space<vmem>>, vector<128x128xf32>,
    %12 = tpu.iota {dimensions = array<i32: 0>} : vector<8x128xi32>
    %c0_9 = arith.constant 0 : index
    %c0_10 = arith.constant 0 : index
    %13 = vector.load %arg2[%c0_9, %c0_10] : memref<1x128xi32, #tpu.memory_space<vmem>>, vector<1x128xi32>
    %14 = vector.broadcast %13 : vector<1x128xi32> to vector<8x128xi32>
    %15 = arith.cmpi eq, %12, %14 : vector<8x128xi32>
    %16 = arith.extui %15 : vector<8x128xi1> to vector<8x128xi32>
    %17 = arith.sitofp %16 : vector<8x128xi32> to vector<8x128xf32>
    %c0_11 = arith.constant 0 : index
    %c0_12 = arith.constant 0 : index
    %18 = vector.load %arg13[%c0_11, %c0_12] : memref<8x128xf32, #tpu.memory_space<vmem>>, vector<8x128xf32>
    %cst_13 = arith.constant dense<0.000000e+00> : vector<8x128xf32>
    %19 = tpu.matmul %17, %10, %cst_13 {dimension_numbers = #tpu.dot_dimension_numbers<[1], [0], [0], [1], [0, 0, 1, 1], [], []>} : vector<8x128xf32>, vector<128x128xf32>, vector<8x128xf32> -> vector<8x128xf32>
    %20 = arith.addf %18, %19 : vector<8x128xf32>
    %c0_14 = arith.constant 0 : index
    %c0_15 = arith.constant 0 : index
    %21 = vector.load %arg13[%c0_14, %c0_15] : memref<8x128xf32, #tpu.memory_space<vmem>>, vector<8x128xf32>
    tpu.vector_store %arg13[%c0_14, %c0_15], %20 {strides = array<i32>} : memref<8x128xf32, #tpu.memory_space<vmem>>, vector<8x128xf32>,
    %c0_16 = arith.constant 0 : index
    %c0_17 = arith.constant 0 : index
    %22 = vector.load %arg14[%c0_16, %c0_17] : memref<1x128xf32, #tpu.memory_space<vmem>>, vector<1x128xf32>
    %cst_18 = arith.constant dense<0.000000e+00> : vector<128xf32>
    %23 = vector.multi_reduction <add>, %10, %cst_18 [0] : vector<128x128xf32> to vector<128xf32>
    %24 = vector.shape_cast %23 : vector<128xf32> to vector<1x128xf32>
    %25 = arith.addf %22, %24 : vector<1x128xf32>
    %c0_19 = arith.constant 0 : index
    %c0_20 = arith.constant 0 : index
    %26 = vector.load %arg14[%c0_19, %c0_20] : memref<1x128xf32, #tpu.memory_space<vmem>>, vector<1x128xf32>
    tpu.vector_store %arg14[%c0_19, %c0_20], %25 {strides = array<i32>} : memref<1x128xf32, #tpu.memory_space<vmem>>, vector<1x128xf32>,
    %c0_i32_21 = arith.constant 0 : i32
    %27 = arith.cmpi eq, %arg0, %c0_i32_21 : i32
    %28 = arith.extui %27 : i1 to i32
    %c0_i32_22 = arith.constant 0 : i32
    %29 = arith.cmpi ne, %28, %c0_i32_22 : i32
    scf.if %29 {
      %c0_23 = arith.constant 0 : index
      %c0_24 = arith.constant 0 : index
      %30 = vector.load %arg13[%c0_23, %c0_24] : memref<8x128xf32, #tpu.memory_space<vmem>>, vector<8x128xf32>
      %c0_25 = arith.constant 0 : index
      %c0_26 = arith.constant 0 : index
      %31 = vector.load %arg6[%c0_25, %c0_26] : memref<256x128xf32, #tpu.memory_space<vmem>>, vector<128x128xf32>
      %cst_27 = arith.constant dense<0.000000e+00> : vector<8x128xf32>
      %32 = tpu.matmul %30, %31, %cst_27 {dimension_numbers = #tpu.dot_dimension_numbers<[1], [0], [0], [1], [0, 0, 1, 1], [], []>} : vector<8x128xf32>, vector<128x128xf32>, vector<8x128xf32> -> vector<8x128xf32>
      %c0_28 = arith.constant 0 : index
      %c0_29 = arith.constant 0 : index
      %33 = vector.load %arg3[%c0_28, %c0_29] : memref<8x128xf32, #tpu.memory_space<vmem>>, vector<8x128xf32>
      %c128 = arith.constant 128 : index
      %c0_30 = arith.constant 0 : index
      %34 = vector.load %arg6[%c128, %c0_30] : memref<256x128xf32, #tpu.memory_space<vmem>>, vector<128x128xf32>
      %cst_31 = arith.constant dense<0.000000e+00> : vector<8x128xf32>
      %35 = tpu.matmul %33, %34, %cst_31 {dimension_numbers = #tpu.dot_dimension_numbers<[1], [0], [0], [1], [0, 0, 1, 1], [], []>} : vector<8x128xf32>, vector<128x128xf32>, vector<8x128xf32> -> vector<8x128xf32>
      %36 = arith.addf %32, %35 : vector<8x128xf32>
      %c0_32 = arith.constant 0 : index
      %c0_33 = arith.constant 0 : index
      %37 = vector.load %arg7[%c0_32, %c0_33] : memref<1x128xf32, #tpu.memory_space<vmem>>, vector<1x128xf32>
      %38 = vector.broadcast %37 : vector<1x128xf32> to vector<8x128xf32>
      %39 = arith.addf %36, %38 : vector<8x128xf32>
      %cst_34 = arith.constant 0.000000e+00 : f32
      %40 = vector.broadcast %cst_34 : f32 to vector<8x128xf32>
      %41 = arith.maximumf %39, %40 : vector<8x128xf32>
      %42 = tpu.iota {dimensions = array<i32: 0>} : vector<8x1xi32>
      %c8_i32 = arith.constant 8 : i32
      %43 = vector.broadcast %c8_i32 : i32 to vector<8x1xi32>
      %44 = arith.cmpi slt, %42, %43 : vector<8x1xi32>
      %cst_35 = arith.constant 0.000000e+00 : f32
      %45 = vector.shape_cast %44 : vector<8x1xi1> to vector<8x1xi1>
      %46 = vector.broadcast %45 : vector<8x1xi1> to vector<8x128xi1>
      %47 = vector.broadcast %cst_35 : f32 to vector<8x128xf32>
      %48 = arith.select %46, %41, %47 : vector<8x128xi1>, vector<8x128xf32>
      %c0_36 = arith.constant 0 : index
      %c0_37 = arith.constant 0 : index
      %49 = vector.load %arg11[%c0_36, %c0_37] : memref<8x128xf32, #tpu.memory_space<vmem>>, vector<8x128xf32>
      tpu.vector_store %arg11[%c0_36, %c0_37], %48 {strides = array<i32>} : memref<8x128xf32, #tpu.memory_space<vmem>>, vector<8x128xf32>,
      %c0_38 = arith.constant 0 : index
      %c0_39 = arith.constant 0 : index
      %50 = vector.load %arg14[%c0_38, %c0_39] : memref<1x128xf32, #tpu.memory_space<vmem>>, vector<1x128xf32>
      %c0_40 = arith.constant 0 : index
      %c0_41 = arith.constant 0 : index
      %51 = vector.load %arg5[%c0_40, %c0_41] : memref<1x128xf32, #tpu.memory_space<vmem>>, vector<1x128xf32>
      %cst_42 = arith.constant 0.000000e+00 : f32
      %52 = vector.broadcast %cst_42 : f32 to vector<1x128xf32>
      %53 = arith.maximumf %51, %52 : vector<1x128xf32>
      %cst_43 = arith.constant 1.120000e+02 : f32
      %54 = vector.broadcast %cst_43 : f32 to vector<1x128xf32>
      %55 = arith.mulf %54, %53 : vector<1x128xf32>
      %56 = arith.subf %50, %55 : vector<1x128xf32>
      %cst_44 = arith.constant 6.250000e-02 : f32
      %57 = vector.broadcast %cst_44 : f32 to vector<1x128xf32>
      %58 = arith.mulf %56, %57 : vector<1x128xf32>
      %cst_45 = arith.constant dense<0.000000e+00> : vector<128xf32>
      %59 = vector.multi_reduction <add>, %48, %cst_45 [0] : vector<8x128xf32> to vector<128xf32>
      %60 = vector.shape_cast %59 : vector<128xf32> to vector<1x128xf32>
      %cst_46 = arith.constant 1.250000e-01 : f32
      %61 = vector.broadcast %cst_46 : f32 to vector<1x128xf32>
      %62 = arith.mulf %60, %61 : vector<1x128xf32>
      %c0_47 = arith.constant 0 : index
      %c0_48 = arith.constant 0 : index
      %63 = vector.load %arg8[%c0_47, %c0_48] : memref<256x128xf32, #tpu.memory_space<vmem>>, vector<128x128xf32>
      %cst_49 = arith.constant dense<0.000000e+00> : vector<1x128xf32>
      %64 = tpu.matmul %58, %63, %cst_49 {dimension_numbers = #tpu.dot_dimension_numbers<[1], [0], [0], [1], [0, 0, 1, 1], [], []>} : vector<1x128xf32>, vector<128x128xf32>, vector<1x128xf32> -> vector<1x128xf32>
      %c128_50 = arith.constant 128 : index
      %c0_51 = arith.constant 0 : index
      %65 = vector.load %arg8[%c128_50, %c0_51] : memref<256x128xf32, #tpu.memory_space<vmem>>, vector<128x128xf32>
      %cst_52 = arith.constant dense<0.000000e+00> : vector<1x128xf32>
      %66 = tpu.matmul %62, %65, %cst_52 {dimension_numbers = #tpu.dot_dimension_numbers<[1], [0], [0], [1], [0, 0, 1, 1], [], []>} : vector<1x128xf32>, vector<128x128xf32>, vector<1x128xf32> -> vector<1x128xf32>
      %67 = arith.addf %64, %66 : vector<1x128xf32>
      %c0_53 = arith.constant 0 : index
      %c0_54 = arith.constant 0 : index
      %68 = vector.load %arg9[%c0_53, %c0_54] : memref<1x128xf32, #tpu.memory_space<vmem>>, vector<1x128xf32>
      %69 = arith.addf %67, %68 : vector<1x128xf32>
      %cst_55 = arith.constant 0.000000e+00 : f32
      %70 = vector.broadcast %cst_55 : f32 to vector<1x128xf32>
      %71 = arith.maximumf %69, %70 : vector<1x128xf32>
      %c0_56 = arith.constant 0 : index
      %c0_57 = arith.constant 0 : index
      %72 = vector.load %arg12[%c0_56, %c0_57] : memref<1x128xf32, #tpu.memory_space<vmem>>, vector<1x128xf32>
      tpu.vector_store %arg12[%c0_56, %c0_57], %71 {strides = array<i32>} : memref<1x128xf32, #tpu.memory_space<vmem>>, vector<1x128xf32>,
    } else {
    }
    return
  }
  func.func @transform_0(%arg0: i32) -> (i32, i32) {
    %c0_i32 = arith.constant 0 : i32
    %c0_i32_0 = arith.constant 0 : i32
    return %arg0, %c0_i32 : i32, i32
  }
  func.func @transform_1(%arg0: i32) -> (i32, i32) {
    %c0_i32 = arith.constant 0 : i32
    %c0_i32_0 = arith.constant 0 : i32
    return %c0_i32, %arg0 : i32, i32
  }
  func.func @transform_2(%arg0: i32) -> (i32, i32) {
    %c0_i32 = arith.constant 0 : i32
    %c0_i32_0 = arith.constant 0 : i32
    %c0_i32_1 = arith.constant 0 : i32
    return %c0_i32, %c0_i32_0 : i32, i32
  }
  func.func @transform_3(%arg0: i32) -> (i32, i32) {
    %c0_i32 = arith.constant 0 : i32
    %c0_i32_0 = arith.constant 0 : i32
    %c0_i32_1 = arith.constant 0 : i32
    return %c0_i32, %c0_i32_0 : i32, i32
  }
  func.func @transform_4(%arg0: i32) -> (i32, i32) {
    %c0_i32 = arith.constant 0 : i32
    %c0_i32_0 = arith.constant 0 : i32
    %c0_i32_1 = arith.constant 0 : i32
    return %c0_i32, %c0_i32_0 : i32, i32
  }
  func.func @transform_5(%arg0: i32) -> (i32, i32) {
    %c0_i32 = arith.constant 0 : i32
    %c0_i32_0 = arith.constant 0 : i32
    %c0_i32_1 = arith.constant 0 : i32
    return %c0_i32, %c0_i32_0 : i32, i32
  }
  func.func @transform_6(%arg0: i32) -> (i32, i32) {
    %c0_i32 = arith.constant 0 : i32
    %c0_i32_0 = arith.constant 0 : i32
    %c0_i32_1 = arith.constant 0 : i32
    return %c0_i32, %c0_i32_0 : i32, i32
  }
  func.func @transform_7(%arg0: i32) -> (i32, i32) {
    %c0_i32 = arith.constant 0 : i32
    %c0_i32_0 = arith.constant 0 : i32
    %c0_i32_1 = arith.constant 0 : i32
    return %c0_i32, %c0_i32_0 : i32, i32
  }
  func.func @transform_8(%arg0: i32) -> (i32, i32) {
    %c0_i32 = arith.constant 0 : i32
    %c0_i32_0 = arith.constant 0 : i32
    %c0_i32_1 = arith.constant 0 : i32
    return %c0_i32, %c0_i32_0 : i32, i32
  }
  func.func @transform_9(%arg0: i32) -> (i32, i32) {
    %c0_i32 = arith.constant 0 : i32
    %c0_i32_0 = arith.constant 0 : i32
    return %arg0, %c0_i32 : i32, i32
  }
  func.func @transform_10(%arg0: i32) -> (i32, i32) {
    %c0_i32 = arith.constant 0 : i32
    %c0_i32_0 = arith.constant 0 : i32
    %c0_i32_1 = arith.constant 0 : i32
    return %c0_i32, %c0_i32_0 : i32, i32
  }
  func.func @transform_11(%arg0: i32) -> (i32, i32) {
    %c0_i32 = arith.constant 0 : i32
    %c0_i32_0 = arith.constant 0 : i32
    %c0_i32_1 = arith.constant 0 : i32
    return %c0_i32, %c0_i32_0 : i32, i32
  }
}

module attributes {stable_mosaic.version = 11 : i64} {
  func.func @gn_block_kernel(%arg0: i32, %arg1: memref<128x128xf32, #tpu.memory_space<vmem>>, %arg2: memref<1x128xi32, #tpu.memory_space<vmem>>, %arg3: memref<8x128xf32, #tpu.memory_space<vmem>>, %arg4: memref<128x128xf32, #tpu.memory_space<vmem>>, %arg5: memref<1x128xf32, #tpu.memory_space<vmem>>, %arg6: memref<256x128xf32, #tpu.memory_space<vmem>>, %arg7: memref<1x128xf32, #tpu.memory_space<vmem>>, %arg8: memref<256x128xf32, #tpu.memory_space<vmem>>, %arg9: memref<1x128xf32, #tpu.memory_space<vmem>>, %arg10: memref<128x128xf32, #tpu.memory_space<vmem>>, %arg11: memref<8x128xf32, #tpu.memory_space<vmem>>, %arg12: memref<1x128xf32, #tpu.memory_space<vmem>>, %arg13: memref<8x128xf32, #tpu.memory_space<vmem>>, %arg14: memref<1x128xf32, #tpu.memory_space<vmem>>) attributes {dimension_semantics = [#tpu.dimension_semantics<arbitrary>], iteration_bounds = array<i64: 1>, scalar_prefetch = 0 : i64, scratch_operands = 2 : i64, tpu.core_type = #tpu.core_type<tc>, window_params = [{transform_indices = @transform_0, window_bounds = array<i64: 128, 128>}, {transform_indices = @transform_1, window_bounds = array<i64: 1, 128>}, {pipeline_mode = #tpu.pipeline_mode<synchronous>, transform_indices = @transform_2, window_bounds = array<i64: 8, 128>}, {pipeline_mode = #tpu.pipeline_mode<synchronous>, transform_indices = @transform_3, window_bounds = array<i64: 128, 128>}, {pipeline_mode = #tpu.pipeline_mode<synchronous>, transform_indices = @transform_4, window_bounds = array<i64: 1, 128>}, {pipeline_mode = #tpu.pipeline_mode<synchronous>, transform_indices = @transform_5, window_bounds = array<i64: 256, 128>}, {pipeline_mode = #tpu.pipeline_mode<synchronous>, transform_indices = @transform_6, window_bounds = array<i64: 1, 128>}, {pipeline_mode = #tpu.pipeline_mode<synchronous>, transform_indices = @transform_7, window_bounds = array<i64: 256, 128>}, {pipeline_mode = #tpu.pipeline_mode<synchronous>, transform_indices = @transform_8, window_bounds = array<i64: 1, 128>}, {transform_indices = @transform_9, window_bounds = array<i64: 128, 128>}, {pipeline_mode = #tpu.pipeline_mode<synchronous>, transform_indices = @transform_10, window_bounds = array<i64: 8, 128>}, {pipeline_mode = #tpu.pipeline_mode<synchronous>, transform_indices = @transform_11, window_bounds = array<i64: 1, 128>}]} {
    %c0_i32 = arith.constant 0 : i32
    %0 = arith.cmpi eq, %arg0, %c0_i32 : i32
    %1 = arith.extui %0 : i1 to i32
    %c0_i32_0 = arith.constant 0 : i32
    %2 = arith.cmpi ne, %1, %c0_i32_0 : i32
    scf.if %2 {
      %cst_23 = arith.constant 0.000000e+00 : f32
      %30 = vector.broadcast %cst_23 : f32 to vector<8x128xf32>
      %c0_24 = arith.constant 0 : index
      %c0_25 = arith.constant 0 : index
      %31 = vector.load %arg13[%c0_24, %c0_25] : memref<8x128xf32, #tpu.memory_space<vmem>>, vector<8x128xf32>
      tpu.vector_store %arg13[%c0_24, %c0_25], %30 {strides = array<i32>} : memref<8x128xf32, #tpu.memory_space<vmem>>, vector<8x128xf32>,
      %cst_26 = arith.constant 0.000000e+00 : f32
      %32 = vector.broadcast %cst_26 : f32 to vector<1x128xf32>
      %c0_27 = arith.constant 0 : index
      %c0_28 = arith.constant 0 : index
      %33 = vector.load %arg14[%c0_27, %c0_28] : memref<1x128xf32, #tpu.memory_space<vmem>>, vector<1x128xf32>
      tpu.vector_store %arg14[%c0_27, %c0_28], %32 {strides = array<i32>} : memref<1x128xf32, #tpu.memory_space<vmem>>, vector<1x128xf32>,
    } else {
    }
    %c0 = arith.constant 0 : index
    %c0_1 = arith.constant 0 : index
    %3 = vector.load %arg1[%c0, %c0_1] : memref<128x128xf32, #tpu.memory_space<vmem>>, vector<128x128xf32>
    %c0_2 = arith.constant 0 : index
    %c0_3 = arith.constant 0 : index
    %4 = vector.load %arg4[%c0_2, %c0_3] : memref<128x128xf32, #tpu.memory_space<vmem>>, vector<128x128xf32>
    %cst = arith.constant dense<0.000000e+00> : vector<128x128xf32>
    %5 = tpu.matmul %3, %4, %cst {dimension_numbers = #tpu.dot_dimension_numbers<[1], [0], [0], [1], [0, 0, 1, 1], [], []>} : vector<128x128xf32>, vector<128x128xf32>, vector<128x128xf32> -> vector<128x128xf32>
    %c0_4 = arith.constant 0 : index
    %c0_5 = arith.constant 0 : index
    %6 = vector.load %arg5[%c0_4, %c0_5] : memref<1x128xf32, #tpu.memory_space<vmem>>, vector<1x128xf32>
    %7 = vector.broadcast %6 : vector<1x128xf32> to vector<128x128xf32>
    %8 = arith.addf %5, %7 : vector<128x128xf32>
    %cst_6 = arith.constant 0.000000e+00 : f32
    %9 = vector.broadcast %cst_6 : f32 to vector<128x128xf32>
    %10 = arith.maximumf %8, %9 : vector<128x128xf32>
    %c0_7 = arith.constant 0 : index
    %c0_8 = arith.constant 0 : index
    %11 = vector.load %arg10[%c0_7, %c0_8] : memref<128x128xf32, #tpu.memory_space<vmem>>, vector<128x128xf32>
    tpu.vector_store %arg10[%c0_7, %c0_8], %10 {strides = array<i32>} : memref<128x128xf32, #tpu.memory_space<vmem>>, vector<128x128xf32>,
    %12 = tpu.iota {dimensions = array<i32: 0>} : vector<8x128xi32>
    %c0_9 = arith.constant 0 : index
    %c0_10 = arith.constant 0 : index
    %13 = vector.load %arg2[%c0_9, %c0_10] : memref<1x128xi32, #tpu.memory_space<vmem>>, vector<1x128xi32>
    %14 = vector.broadcast %13 : vector<1x128xi32> to vector<8x128xi32>
    %15 = arith.cmpi eq, %12, %14 : vector<8x128xi32>
    %16 = arith.extui %15 : vector<8x128xi1> to vector<8x128xi32>
    %17 = arith.sitofp %16 : vector<8x128xi32> to vector<8x128xf32>
    %c0_11 = arith.constant 0 : index
    %c0_12 = arith.constant 0 : index
    %18 = vector.load %arg13[%c0_11, %c0_12] : memref<8x128xf32, #tpu.memory_space<vmem>>, vector<8x128xf32>
    %cst_13 = arith.constant dense<0.000000e+00> : vector<8x128xf32>
    %19 = tpu.matmul %17, %10, %cst_13 {dimension_numbers = #tpu.dot_dimension_numbers<[1], [0], [0], [1], [0, 0, 1, 1], [], []>} : vector<8x128xf32>, vector<128x128xf32>, vector<8x128xf32> -> vector<8x128xf32>
    %20 = arith.addf %18, %19 : vector<8x128xf32>
    %c0_14 = arith.constant 0 : index
    %c0_15 = arith.constant 0 : index
    %21 = vector.load %arg13[%c0_14, %c0_15] : memref<8x128xf32, #tpu.memory_space<vmem>>, vector<8x128xf32>
    tpu.vector_store %arg13[%c0_14, %c0_15], %20 {strides = array<i32>} : memref<8x128xf32, #tpu.memory_space<vmem>>, vector<8x128xf32>,
    %c0_16 = arith.constant 0 : index
    %c0_17 = arith.constant 0 : index
    %22 = vector.load %arg14[%c0_16, %c0_17] : memref<1x128xf32, #tpu.memory_space<vmem>>, vector<1x128xf32>
    %cst_18 = arith.constant dense<0.000000e+00> : vector<128xf32>
    %23 = vector.multi_reduction <add>, %10, %cst_18 [0] : vector<128x128xf32> to vector<128xf32>
    %24 = vector.shape_cast %23 : vector<128xf32> to vector<1x128xf32>
    %25 = arith.addf %22, %24 : vector<1x128xf32>
    %c0_19 = arith.constant 0 : index
    %c0_20 = arith.constant 0 : index
    %26 = vector.load %arg14[%c0_19, %c0_20] : memref<1x128xf32, #tpu.memory_space<vmem>>, vector<1x128xf32>
    tpu.vector_store %arg14[%c0_19, %c0_20], %25 {strides = array<i32>} : memref<1x128xf32, #tpu.memory_space<vmem>>, vector<1x128xf32>,
    %c0_i32_21 = arith.constant 0 : i32
    %27 = arith.cmpi eq, %arg0, %c0_i32_21 : i32
    %28 = arith.extui %27 : i1 to i32
    %c0_i32_22 = arith.constant 0 : i32
    %29 = arith.cmpi ne, %28, %c0_i32_22 : i32
    scf.if %29 {
      %c0_23 = arith.constant 0 : index
      %c0_24 = arith.constant 0 : index
      %30 = vector.load %arg13[%c0_23, %c0_24] : memref<8x128xf32, #tpu.memory_space<vmem>>, vector<8x128xf32>
      %c0_25 = arith.constant 0 : index
      %c0_26 = arith.constant 0 : index
      %31 = vector.load %arg6[%c0_25, %c0_26] : memref<256x128xf32, #tpu.memory_space<vmem>>, vector<128x128xf32>
      %cst_27 = arith.constant dense<0.000000e+00> : vector<8x128xf32>
      %32 = tpu.matmul %30, %31, %cst_27 {dimension_numbers = #tpu.dot_dimension_numbers<[1], [0], [0], [1], [0, 0, 1, 1], [], []>} : vector<8x128xf32>, vector<128x128xf32>, vector<8x128xf32> -> vector<8x128xf32>
      %c0_28 = arith.constant 0 : index
      %c0_29 = arith.constant 0 : index
      %33 = vector.load %arg3[%c0_28, %c0_29] : memref<8x128xf32, #tpu.memory_space<vmem>>, vector<8x128xf32>
      %c128 = arith.constant 128 : index
      %c0_30 = arith.constant 0 : index
      %34 = vector.load %arg6[%c128, %c0_30] : memref<256x128xf32, #tpu.memory_space<vmem>>, vector<128x128xf32>
      %cst_31 = arith.constant dense<0.000000e+00> : vector<8x128xf32>
      %35 = tpu.matmul %33, %34, %cst_31 {dimension_numbers = #tpu.dot_dimension_numbers<[1], [0], [0], [1], [0, 0, 1, 1], [], []>} : vector<8x128xf32>, vector<128x128xf32>, vector<8x128xf32> -> vector<8x128xf32>
      %36 = arith.addf %32, %35 : vector<8x128xf32>
      %c0_32 = arith.constant 0 : index
      %c0_33 = arith.constant 0 : index
      %37 = vector.load %arg7[%c0_32, %c0_33] : memref<1x128xf32, #tpu.memory_space<vmem>>, vector<1x128xf32>
      %38 = vector.broadcast %37 : vector<1x128xf32> to vector<8x128xf32>
      %39 = arith.addf %36, %38 : vector<8x128xf32>
      %cst_34 = arith.constant 0.000000e+00 : f32
      %40 = vector.broadcast %cst_34 : f32 to vector<8x128xf32>
      %41 = arith.maximumf %39, %40 : vector<8x128xf32>
      %42 = tpu.iota {dimensions = array<i32: 0>} : vector<8x1xi32>
      %c8_i32 = arith.constant 8 : i32
      %43 = vector.broadcast %c8_i32 : i32 to vector<8x1xi32>
      %44 = arith.cmpi slt, %42, %43 : vector<8x1xi32>
      %cst_35 = arith.constant 0.000000e+00 : f32
      %45 = vector.shape_cast %44 : vector<8x1xi1> to vector<8x1xi1>
      %46 = vector.broadcast %45 : vector<8x1xi1> to vector<8x128xi1>
      %47 = vector.broadcast %cst_35 : f32 to vector<8x128xf32>
      %48 = arith.select %46, %41, %47 : vector<8x128xi1>, vector<8x128xf32>
      %c0_36 = arith.constant 0 : index
      %c0_37 = arith.constant 0 : index
      %49 = vector.load %arg11[%c0_36, %c0_37] : memref<8x128xf32, #tpu.memory_space<vmem>>, vector<8x128xf32>
      tpu.vector_store %arg11[%c0_36, %c0_37], %48 {strides = array<i32>} : memref<8x128xf32, #tpu.memory_space<vmem>>, vector<8x128xf32>,
      %c0_38 = arith.constant 0 : index
      %c0_39 = arith.constant 0 : index
      %50 = vector.load %arg14[%c0_38, %c0_39] : memref<1x128xf32, #tpu.memory_space<vmem>>, vector<1x128xf32>
      %c0_40 = arith.constant 0 : index
      %c0_41 = arith.constant 0 : index
      %51 = vector.load %arg5[%c0_40, %c0_41] : memref<1x128xf32, #tpu.memory_space<vmem>>, vector<1x128xf32>
      %cst_42 = arith.constant 0.000000e+00 : f32
      %52 = vector.broadcast %cst_42 : f32 to vector<1x128xf32>
      %53 = arith.maximumf %51, %52 : vector<1x128xf32>
      %cst_43 = arith.constant 1.120000e+02 : f32
      %54 = vector.broadcast %cst_43 : f32 to vector<1x128xf32>
      %55 = arith.mulf %54, %53 : vector<1x128xf32>
      %56 = arith.subf %50, %55 : vector<1x128xf32>
      %cst_44 = arith.constant 6.250000e-02 : f32
      %57 = vector.broadcast %cst_44 : f32 to vector<1x128xf32>
      %58 = arith.mulf %56, %57 : vector<1x128xf32>
      %cst_45 = arith.constant dense<0.000000e+00> : vector<128xf32>
      %59 = vector.multi_reduction <add>, %48, %cst_45 [0] : vector<8x128xf32> to vector<128xf32>
      %60 = vector.shape_cast %59 : vector<128xf32> to vector<1x128xf32>
      %cst_46 = arith.constant 1.250000e-01 : f32
      %61 = vector.broadcast %cst_46 : f32 to vector<1x128xf32>
      %62 = arith.mulf %60, %61 : vector<1x128xf32>
      %c0_47 = arith.constant 0 : index
      %c0_48 = arith.constant 0 : index
      %63 = vector.load %arg8[%c0_47, %c0_48] : memref<256x128xf32, #tpu.memory_space<vmem>>, vector<128x128xf32>
      %cst_49 = arith.constant dense<0.000000e+00> : vector<1x128xf32>
      %64 = tpu.matmul %58, %63, %cst_49 {dimension_numbers = #tpu.dot_dimension_numbers<[1], [0], [0], [1], [0, 0, 1, 1], [], []>} : vector<1x128xf32>, vector<128x128xf32>, vector<1x128xf32> -> vector<1x128xf32>
      %c128_50 = arith.constant 128 : index
      %c0_51 = arith.constant 0 : index
      %65 = vector.load %arg8[%c128_50, %c0_51] : memref<256x128xf32, #tpu.memory_space<vmem>>, vector<128x128xf32>
      %cst_52 = arith.constant dense<0.000000e+00> : vector<1x128xf32>
      %66 = tpu.matmul %62, %65, %cst_52 {dimension_numbers = #tpu.dot_dimension_numbers<[1], [0], [0], [1], [0, 0, 1, 1], [], []>} : vector<1x128xf32>, vector<128x128xf32>, vector<1x128xf32> -> vector<1x128xf32>
      %67 = arith.addf %64, %66 : vector<1x128xf32>
      %c0_53 = arith.constant 0 : index
      %c0_54 = arith.constant 0 : index
      %68 = vector.load %arg9[%c0_53, %c0_54] : memref<1x128xf32, #tpu.memory_space<vmem>>, vector<1x128xf32>
      %69 = arith.addf %67, %68 : vector<1x128xf32>
      %cst_55 = arith.constant 0.000000e+00 : f32
      %70 = vector.broadcast %cst_55 : f32 to vector<1x128xf32>
      %71 = arith.maximumf %69, %70 : vector<1x128xf32>
      %c0_56 = arith.constant 0 : index
      %c0_57 = arith.constant 0 : index
      %72 = vector.load %arg12[%c0_56, %c0_57] : memref<1x128xf32, #tpu.memory_space<vmem>>, vector<1x128xf32>
      tpu.vector_store %arg12[%c0_56, %c0_57], %71 {strides = array<i32>} : memref<1x128xf32, #tpu.memory_space<vmem>>, vector<1x128xf32>,
    } else {
    }
    return
  }
  func.func @transform_0(%arg0: i32) -> (i32, i32) {
    %c0_i32 = arith.constant 0 : i32
    %c0_i32_0 = arith.constant 0 : i32
    return %arg0, %c0_i32 : i32, i32
  }
  func.func @transform_1(%arg0: i32) -> (i32, i32) {
    %c0_i32 = arith.constant 0 : i32
    %c0_i32_0 = arith.constant 0 : i32
    return %c0_i32, %arg0 : i32, i32
  }
  func.func @transform_2(%arg0: i32) -> (i32, i32) {
    %c0_i32 = arith.constant 0 : i32
    %c0_i32_0 = arith.constant 0 : i32
    %c0_i32_1 = arith.constant 0 : i32
    return %c0_i32, %c0_i32_0 : i32, i32
  }
  func.func @transform_3(%arg0: i32) -> (i32, i32) {
    %c0_i32 = arith.constant 0 : i32
    %c0_i32_0 = arith.constant 0 : i32
    %c0_i32_1 = arith.constant 0 : i32
    return %c0_i32, %c0_i32_0 : i32, i32
  }
  func.func @transform_4(%arg0: i32) -> (i32, i32) {
    %c0_i32 = arith.constant 0 : i32
    %c0_i32_0 = arith.constant 0 : i32
    %c0_i32_1 = arith.constant 0 : i32
    return %c0_i32, %c0_i32_0 : i32, i32
  }
  func.func @transform_5(%arg0: i32) -> (i32, i32) {
    %c0_i32 = arith.constant 0 : i32
    %c0_i32_0 = arith.constant 0 : i32
    %c0_i32_1 = arith.constant 0 : i32
    return %c0_i32, %c0_i32_0 : i32, i32
  }
  func.func @transform_6(%arg0: i32) -> (i32, i32) {
    %c0_i32 = arith.constant 0 : i32
    %c0_i32_0 = arith.constant 0 : i32
    %c0_i32_1 = arith.constant 0 : i32
    return %c0_i32, %c0_i32_0 : i32, i32
  }
  func.func @transform_7(%arg0: i32) -> (i32, i32) {
    %c0_i32 = arith.constant 0 : i32
    %c0_i32_0 = arith.constant 0 : i32
    %c0_i32_1 = arith.constant 0 : i32
    return %c0_i32, %c0_i32_0 : i32, i32
  }
  func.func @transform_8(%arg0: i32) -> (i32, i32) {
    %c0_i32 = arith.constant 0 : i32
    %c0_i32_0 = arith.constant 0 : i32
    %c0_i32_1 = arith.constant 0 : i32
    return %c0_i32, %c0_i32_0 : i32, i32
  }
  func.func @transform_9(%arg0: i32) -> (i32, i32) {
    %c0_i32 = arith.constant 0 : i32
    %c0_i32_0 = arith.constant 0 : i32
    return %arg0, %c0_i32 : i32, i32
  }
  func.func @transform_10(%arg0: i32) -> (i32, i32) {
    %c0_i32 = arith.constant 0 : i32
    %c0_i32_0 = arith.constant 0 : i32
    %c0_i32_1 = arith.constant 0 : i32
    return %c0_i32, %c0_i32_0 : i32, i32
  }
  func.func @transform_11(%arg0: i32) -> (i32, i32) {
    %c0_i32 = arith.constant 0 : i32
    %c0_i32_0 = arith.constant 0 : i32
    %c0_i32_1 = arith.constant 0 : i32
    return %c0_i32, %c0_i32_0 : i32, i32
  }
}

</mosaic_0001>

<bundles_post_ra>
// kernel: tpu_custom_call.1
= control target key start
LH: loop header
LB: loop body
LE: loop exit
PB: predicated region body
PF: predicated region fallthrough
CT: control target
= control target key end

     0   :  { %17 = vsyncpa [#allocation5], 0  ;;  %s1673_s0 = inlined_call_operand.hbm [shape: f32[128,128], index: 0, kind: input, shape index: {}]   ;;  %s1674_s1 = inlined_call_operand.vmem [shape: s32[1,128], index: 1, kind: input, shape index: {}]   ;;  %s1675_s2 = inlined_call_operand.hbm [shape: f32[8,128], index: 2, kind: input, shape index: {}]   ;;  %s1676_s3 = inlined_call_operand.hbm [shape: f32[128,128], index: 3, kind: input, shape index: {}]   ;;  %s1677_s4 = inlined_call_operand.vmem [shape: f32[1,128], index: 4, kind: input, shape index: {}]   ;;  %s1678_s5 = inlined_call_operand.hbm [shape: f32[256,128], index: 5, kind: input, shape index: {}]   ;;  %s1679_s6 = inlined_call_operand.vmem [shape: f32[1,128], index: 6, kind: input, shape index: {}]   ;;  %s1680_s7 = inlined_call_operand.hbm [shape: f32[256,128], index: 7, kind: input, shape index: {}]   ;;  %s1681_s8 = inlined_call_operand.vmem [shape: f32[1,128], index: 8, kind: input, shape index: {}]   ;;  %s1682_s9 = inlined_call_operand.hbm [shape: f32[128,128], index: 9, kind: output, shape index: {0}]   ;;  %s1683_s10 = inlined_call_operand.hbm [shape: f32[8,128], index: 10, kind: output, shape index: {1}]   ;;  %s1684_s11 = inlined_call_operand.hbm [shape: f32[1,128], index: 11, kind: output, shape index: {2}]  }
   0x1   :  { %18 = vsyncpa [#allocation8], 0 }
   0x2   :  { %19 = vsyncpa [#allocation11], 0 }
   0x3   :  { %20 = vsyncpa [#allocation6], 0 }
   0x4   :  { %21 = vsyncpa [#allocation15], 0  ;;  %s1394_s17 = smov [#allocation7]  }
   0x5   :  { %s42_s18 = sshll.u32 %s1394_s17, 4  ;;  %s43_s18 = int_to_ptr.vmem [resolvable:$true] %s42_s18 }
   0x6   :  { %s1232_s19 = scalar_lea.vmem %s43_s18, 128  ;;  %p1237_p1 = scmp.lt.s32.totalorder %s43_s18, %s43_s18 }
   0x7   :  { %p1233_p0 = scmp.ne.s32.totalorder %s43_s18, %s1232_s19  ;;  %p1238_p2 = scmp.lt.s32.totalorder %s1232_s19, %s1232_s19 }
   0x9   :  { %p1239_p3 = por %p1238_p2, %p1237_p1 }
   0xb   :  { %p1240_p4 = pnand %p1239_p3, %p1233_p0 }
   0xd   :  { %1243 = shalt.err (!%p1240_p4)
}
   0xe   :  { %45 = dma.hbm_to_vmem [thread:$0]  %s1675_s2, 128, %s43_s18, [#allocation8]  }
   0xf   :  { %s1395_s22 = smov [#allocation10]   ;;  %s1396_s24 = smov [#allocation4]  }
  0x10   :  { %s65_s23 = sshll.u32 %s1395_s22, 4  ;;  %s27_s25 = sshll.u32 %s1396_s24, 4  ;;  %s66_s23 = int_to_ptr.vmem [resolvable:$true] %s65_s23  ;;  %s28_s25 = int_to_ptr.vmem [resolvable:$true] %s27_s25 }
  0x11   :  { %s1252_s26 = scalar_lea.vmem %s66_s23, 4096  ;;  %p1257_p6 = scmp.lt.s32.totalorder %s66_s23, %s66_s23 }
  0x12   :  { %p1253_p5 = scmp.ne.s32.totalorder %s66_s23, %s1252_s26  ;;  %p1258_p7 = scmp.lt.s32.totalorder %s1252_s26, %s1252_s26 }
  0x14   :  { %p1259_p8 = por %p1258_p7, %p1257_p6 }
  0x16   :  { %p1260_p9 = pnand %p1259_p8, %p1253_p5 }
  0x18   :  { %1263 = shalt.err (!%p1260_p9)
}
  0x19   :  { %s1397_s27 = smov 128   ;;  %s1398_s28 = smov 8  }
  0x1a   :  { %71 = dma.hbm_to_vmem [thread:$0]  %s1678_s5, 4096, %s66_s23, [#allocation11], %s1397_s27, %s1397_s27, %s1398_s28  }
  0x1b   :  { %s1272_s2 = scalar_lea.vmem %s28_s25, 2048  ;;  %p1277_p11 = scmp.lt.s32.totalorder %s28_s25, %s28_s25 }
  0x1c   :  { %p1273_p10 = scmp.ne.s32.totalorder %s28_s25, %s1272_s2  ;;  %p1278_p12 = scmp.lt.s32.totalorder %s1272_s2, %s1272_s2 }
  0x1e   :  { %p1279_p13 = por %p1278_p12, %p1277_p11 }
  0x20   :  { %p1280_p0 = pnand %p1279_p13, %p1273_p10 }
  0x22   :  { %1283 = shalt.err (!%p1280_p0)
}
  0x23   :  { %33 = dma.hbm_to_vmem [thread:$0]  %s1673_s0, 2048, %s28_s25, [#allocation5], %s1397_s27, %s1397_s27, %s1398_s28  }
  0x24   :  { %s1399_s14 = smov [#allocation9]   ;;  %s1400_s16 = smov [#allocation12]  }
  0x25   :  { %s51_s15 = sshll.u32 %s1399_s14, 4  ;;  %s79_s5 = sshll.u32 %s1400_s16, 4  ;;  %s52_s15 = int_to_ptr.vmem [resolvable:$true] %s51_s15  ;;  %s80_s5 = int_to_ptr.vmem [resolvable:$true] %s79_s5 }
  0x26   :  { %s1292_s17 = scalar_lea.vmem %s52_s15, 2048  ;;  %p1297_p2 = scmp.lt.s32.totalorder %s52_s15, %s52_s15 }
  0x27   :  { %p1293_p1 = scmp.ne.s32.totalorder %s52_s15, %s1292_s17  ;;  %p1298_p3 = scmp.lt.s32.totalorder %s1292_s17, %s1292_s17 }
  0x29   :  { %p1299_p4 = por %p1298_p3, %p1297_p2 }
  0x2b   :  { %p1300_p5 = pnand %p1299_p4, %p1293_p1 }
  0x2d   :  { %1303 = shalt.err (!%p1300_p5)
}
  0x2e   :  { %57 = dma.hbm_to_vmem [thread:$0]  %s1676_s3, 2048, %s52_s15, [#allocation8], %s1397_s27, %s1397_s27, %s1398_s28  }
  0x2f   :  { %s1312_s0 = scalar_lea.vmem %s80_s5, 4096  ;;  %p1317_p7 = scmp.lt.s32.totalorder %s80_s5, %s80_s5 }
  0x30   :  { %p1313_p6 = scmp.ne.s32.totalorder %s80_s5, %s1312_s0  ;;  %p1318_p8 = scmp.lt.s32.totalorder %s1312_s0, %s1312_s0 }
  0x32   :  { %p1319_p9 = por %p1318_p8, %p1317_p7 }
  0x34   :  { %p1320_p10 = pnand %p1319_p9, %p1313_p6 }
  0x36   :  { %1323 = shalt.err (!%p1320_p10)
}
  0x37   :  { %85 = dma.hbm_to_vmem [thread:$0]  %s1680_s7, 4096, %s80_s5, [#allocation11], %s1397_s27, %s1397_s27, %s1398_s28  }
  0x38   :  { %1384 = dma.done.wait [#allocation5], 2048  }
  0x39   :  { %1385 = vsyncadd [#allocation5], 4294965248 }
  0x3a   :  { %1386 = dma.done.wait [#allocation8], 2176  }
  0x3b   :  { %1387 = vsyncadd [#allocation8], 4294965120 }
  0x3c   :  { %1388 = dma.done.wait [#allocation11], 8192  }
  0x3d   :  { %1389 = vsyncadd [#allocation11], 4294959104  ;;  %v140_v0 = vld [vmem:[#allocation9 + $0x78] sm:$0xff]  ;;  %v139_v1 = vld [vmem:[#allocation9 + $0x70] sm:$0xff]  ;;  %v1401_v32 = vmov 0.0   ;;  %vm1402_vm0 = vmmov 0  }
  0x3e   :  { %980 = vmatprep.subr.mxu0 %v140_v0  ;;  %v138_v2 = vld [vmem:[#allocation9 + $0x68] sm:$0xff]  ;;  %v137_v3 = vld [vmem:[#allocation9 + $0x60] sm:$0xff]  ;;  %v109_v4 = vld [vmem:[#allocation4] sm:$0xff]  ;;  %108 = vst [vmem:[#allocation3] sm:$0x1] %v1401_v32  ;;  %1036 = vmatprep.subr.mxu1 %v1401_v32  ;;  %s1404_s26 = smov [#allocation14]  }
  0x3f   :  { %981 = vmatpush3.msra.mxu0 %v140_v0  ;;  %v136_v5 = vld [vmem:[#allocation9 + $0x58] sm:$0xff]  ;;  %1012 = vmatprep.mubr.f32.mxu0 %v109_v4  ;;  %v135_v6 = vld [vmem:[#allocation9 + $0x50] sm:$0xff]  ;;  %v134_v7 = vld [vmem:[#allocation9 + $0x48] sm:$0xff]  ;;  %s830_s29 = sshll.u32 %s1404_s26, 4  ;;  %s831_s29 = int_to_ptr.vmem [resolvable:$true] %s830_s29 }
  0x40   :  { %982 = vmatprep.subr.mxu0 %v139_v1  ;;  %v133_v8 = vld [vmem:[#allocation9 + $0x40] sm:$0xff]  ;;  %v132_v9 = vld [vmem:[#allocation9 + $0x38] sm:$0xff]  ;;  %v131_v10 = vld [vmem:[#allocation9 + $0x30] sm:$0xff]  ;;  %1068 = vmatprep.mubr.msk.f32.mxu1 %vm1402_vm0, %v1401_v32  ;;  %s1324_s2 = scalar_lea.vmem %s831_s29, 128  ;;  %p1329_p12 = scmp.lt.s32.totalorder %s831_s29, %s831_s29 }
  0x41   :  { %983 = vmatpush3.msra.mxu0 %v139_v1  ;;  %v130_v11 = vld [vmem:[#allocation9 + $0x28] sm:$0xff]  ;;  %v129_v12 = vld [vmem:[#allocation9 + $0x20] sm:$0xff]  ;;  %v128_v13 = vld [vmem:[#allocation9 + $0x18] sm:$0xff]  ;;  %p1325_p11 = scmp.ne.s32.totalorder %s831_s29, %s1324_s2  ;;  %p1330_p13 = scmp.lt.s32.totalorder %s1324_s2, %s1324_s2 }
  0x42   :  { %984 = vmatprep.subr.mxu0 %v138_v2  ;;  %v127_v14 = vld [vmem:[#allocation9 + $0x10] sm:$0xff]  ;;  %v126_v15 = vld [vmem:[#allocation9 + $0x8] sm:$0xff]  ;;  %v125_v16 = vld [vmem:[#allocation9] sm:$0xff] }
  0x43   :  { %985 = vmatpush3.msra.mxu0 %v138_v2  ;;  %v110_v17 = vld [vmem:[#allocation4 + $0x8] sm:$0xff]  ;;  %v111_v18 = vld [vmem:[#allocation4 + $0x10] sm:$0xff]  ;;  %v112_v19 = vld [vmem:[#allocation4 + $0x18] sm:$0xff]  ;;  %p1331_p0 = por %p1330_p13, %p1329_p12 }
  0x44   :  { %986 = vmatprep.subr.mxu0 %v137_v3  ;;  %v113_v20 = vld [vmem:[#allocation4 + $0x20] sm:$0xff]  ;;  %v114_v21 = vld [vmem:[#allocation4 + $0x28] sm:$0xff]  ;;  %v115_v22 = vld [vmem:[#allocation4 + $0x30] sm:$0xff] }
  0x45   :  { %987 = vmatpush3.msra.mxu0 %v137_v3  ;;  %v116_v23 = vld [vmem:[#allocation4 + $0x38] sm:$0xff]  ;;  %v117_v24 = vld [vmem:[#allocation4 + $0x40] sm:$0xff]  ;;  %v118_v25 = vld [vmem:[#allocation4 + $0x48] sm:$0xff]  ;;  %p1332_p1 = pnand %p1331_p0, %p1325_p11 }
  0x46   :  { %988 = vmatprep.subr.mxu0 %v136_v5  ;;  %v119_v26 = vld [vmem:[#allocation4 + $0x50] sm:$0xff]  ;;  %v120_v27 = vld [vmem:[#allocation4 + $0x58] sm:$0xff]  ;;  %v121_v28 = vld [vmem:[#allocation4 + $0x60] sm:$0xff] }
  0x47   :  { %989 = vmatpush3.msra.mxu0 %v136_v5  ;;  %v122_v29 = vld [vmem:[#allocation4 + $0x68] sm:$0xff]  ;;  %v123_v30 = vld [vmem:[#allocation4 + $0x70] sm:$0xff]  ;;  %v124_v31 = vld [vmem:[#allocation4 + $0x78] sm:$0xff] }
  0x48   :  { %990 = vmatprep.subr.mxu0 %v135_v6  ;;  %v468_v33 = vld [vmem:[#allocation10 + $0xf8] sm:$0xff]  ;;  %v467_v34 = vld [vmem:[#allocation10 + $0xf0] sm:$0xff]  ;;  %v466_v35 = vld [vmem:[#allocation10 + $0xe8] sm:$0xff] }
  0x49   :  { %991 = vmatpush3.msra.mxu0 %v135_v6  ;;  %v465_v36 = vld [vmem:[#allocation10 + $0xe0] sm:$0xff]  ;;  %v464_v37 = vld [vmem:[#allocation10 + $0xd8] sm:$0xff]  ;;  %v463_v38 = vld [vmem:[#allocation10 + $0xd0] sm:$0xff] }
  0x4a   :  { %992 = vmatprep.subr.mxu0 %v134_v7  ;;  %v462_v39 = vld [vmem:[#allocation10 + $0xc8] sm:$0xff]  ;;  %v461_v40 = vld [vmem:[#allocation10 + $0xc0] sm:$0xff]  ;;  %v460_v41 = vld [vmem:[#allocation10 + $0xb8] sm:$0xff] }
  0x4b   :  { %993 = vmatpush3.msra.mxu0 %v134_v7  ;;  %v459_v42 = vld [vmem:[#allocation10 + $0xb0] sm:$0xff]  ;;  %v458_v43 = vld [vmem:[#allocation10 + $0xa8] sm:$0xff]  ;;  %v457_v44 = vld [vmem:[#allocation10 + $0xa0] sm:$0xff] }
  0x4c   :  { %994 = vmatprep.subr.mxu0 %v133_v8  ;;  %v456_v45 = vld [vmem:[#allocation10 + $0x98] sm:$0xff]  ;;  %v455_v46 = vld [vmem:[#allocation10 + $0x90] sm:$0xff]  ;;  %v454_v47 = vld [vmem:[#allocation10 + $0x88] sm:$0xff] }
  0x4d   :  { %995 = vmatpush3.msra.mxu0 %v133_v8  ;;  %v453_v48 = vld [vmem:[#allocation10 + $0x80] sm:$0xff]  ;;  %v452_v49 = vld [vmem:[#allocation7] sm:$0xff]  ;;  %v1522_v50 = vld [vmem:[%s1677_s4] ss:$0 sm:$0xff] }
  0x4e   :  { %996 = vmatprep.subr.mxu0 %v132_v9 }
  0x4f   :  { %997 = vmatpush3.msra.mxu0 %v132_v9 }
  0x50   :  { %998 = vmatprep.subr.mxu0 %v131_v10 }
  0x51   :  { %999 = vmatpush3.msra.mxu0 %v131_v10 }
  0x52   :  { %1000 = vmatprep.subr.mxu0 %v130_v11 }
  0x53   :  { %1001 = vmatpush3.msra.mxu0 %v130_v11 }
  0x54   :  { %1002 = vmatprep.subr.mxu0 %v129_v12 }
  0x55   :  { %1003 = vmatpush3.msra.mxu0 %v129_v12 }
  0x56   :  { %1004 = vmatprep.subr.mxu0 %v128_v13 }
  0x57   :  { %1005 = vmatpush3.msra.mxu0 %v128_v13 }
  0x58   :  { %1006 = vmatprep.subr.mxu0 %v127_v14 }
  0x59   :  { %1007 = vmatpush3.msra.mxu0 %v127_v14 }
  0x5a   :  { %1008 = vmatprep.subr.mxu0 %v126_v15 }
  0x5b   :  { %1009 = vmatpush3.msra.mxu0 %v126_v15 }
  0x5c   :  { %1010 = vmatprep.subr.mxu0 %v125_v16 }
  0x5d   :  { %1011 = vmatpush3.msra.mxu0 %v125_v16 }
  0x5e   :  { %1013 = vmatmul.mubr.f32.vlgmr.msra.gmra.mxu0 %v110_v17  ;;  %1071 = vmatprep.subr.mxu0 %v1401_v32 }
  0x5f   :  { %1015 = vmatprep.mubr.f32.mxu0 %v111_v18  ;;  %1072 = vmatpush3.msra.mxu0 %v468_v33 }
  0x60   :  { %1073 = vmatprep.subr.mxu0 %v1401_v32 }
  0x61   :  { %1074 = vmatpush3.msra.mxu0 %v467_v34 }
  0x62   :  { %1016 = vmatmul.mubr.f32.gmra.mxu0 %v112_v19  ;;  %1075 = vmatprep.subr.mxu0 %v1401_v32 }
  0x63   :  { %1018 = vmatprep.mubr.f32.mxu0 %v113_v20  ;;  %1076 = vmatpush3.msra.mxu0 %v466_v35 }
  0x64   :  { %1077 = vmatprep.subr.mxu0 %v1401_v32 }
  0x65   :  { %1078 = vmatpush3.msra.mxu0 %v465_v36 }
  0x66   :  { %1019 = vmatmul.mubr.f32.gmra.mxu0 %v114_v21  ;;  %1079 = vmatprep.subr.mxu0 %v1401_v32 }
  0x67   :  { %1021 = vmatprep.mubr.f32.mxu0 %v115_v22  ;;  %1080 = vmatpush3.msra.mxu0 %v464_v37 }
  0x68   :  { %1081 = vmatprep.subr.mxu0 %v1401_v32 }
  0x69   :  { %1082 = vmatpush3.msra.mxu0 %v463_v38 }
  0x6a   :  { %1022 = vmatmul.mubr.f32.gmra.mxu0 %v116_v23  ;;  %1083 = vmatprep.subr.mxu0 %v1401_v32 }
  0x6b   :  { %1024 = vmatprep.mubr.f32.mxu0 %v117_v24  ;;  %1084 = vmatpush3.msra.mxu0 %v462_v39 }
  0x6c   :  { %1085 = vmatprep.subr.mxu0 %v1401_v32 }
  0x6d   :  { %1086 = vmatpush3.msra.mxu0 %v461_v40 }
  0x6e   :  { %1025 = vmatmul.mubr.f32.gmra.mxu0 %v118_v25  ;;  %1087 = vmatprep.subr.mxu0 %v1401_v32 }
  0x6f   :  { %1027 = vmatprep.mubr.f32.mxu0 %v119_v26  ;;  %1088 = vmatpush3.msra.mxu0 %v460_v41 }
  0x70   :  { %1089 = vmatprep.subr.mxu0 %v1401_v32 }
  0x71   :  { %1090 = vmatpush3.msra.mxu0 %v459_v42 }
  0x72   :  { %1028 = vmatmul.mubr.f32.gmra.mxu0 %v120_v27  ;;  %1091 = vmatprep.subr.mxu0 %v1401_v32 }
  0x73   :  { %1030 = vmatprep.mubr.f32.mxu0 %v121_v28  ;;  %1092 = vmatpush3.msra.mxu0 %v458_v43 }
  0x74   :  { %1093 = vmatprep.subr.mxu0 %v1401_v32 }
  0x75   :  { %1094 = vmatpush3.msra.mxu0 %v457_v44 }
  0x76   :  { %1031 = vmatmul.mubr.f32.gmra.mxu0 %v122_v29  ;;  %1095 = vmatprep.subr.mxu0 %v1401_v32 }
  0x77   :  { %1033 = vmatprep.mubr.f32.mxu0 %v123_v30  ;;  %1096 = vmatpush3.msra.mxu0 %v456_v45 }
  0x78   :  { %1097 = vmatprep.subr.mxu0 %v1401_v32 }
  0x79   :  { %1098 = vmatpush3.msra.mxu0 %v455_v46 }
  0x7a   :  { %1034 = vmatmul.mubr.f32.gmra.mxu0 %v124_v31  ;;  %1099 = vmatprep.subr.mxu0 %v1401_v32 }
  0x7b   :  { %1103 = vmatprep.mubr.msk.f32.mxu0 %vm1402_vm0, %v1401_v32  ;;  %1100 = vmatpush3.msra.mxu0 %v454_v47 }
  0x7c   :  { %1101 = vmatprep.subr.mxu0 %v1401_v32 }
  0x7d   :  { %1102 = vmatpush3.msra.mxu0 %v453_v48 }
  0x7e   :  { %1104 = vmatmul.mubr.f32.vlgmr.msra.gmra.mxu0 %v452_v49  ;;  %1141 = vmatprep.subr.mxu0 %v1401_v32 }
  0x7f   :  { %1173 = vmatprep.mubr.msk.f32.mxu0 %vm1402_vm0, %v1401_v32 }
 0x11e   :  { %v1014_v51 = vpop.f32.mrf.mxu0 }
 0x11f   :  { %v220_v52 = vadd.f32 %v1014_v51, %v1522_v50 }
 0x120   :  { %v214_v53 = vpop.f32.mrf.mxu0 }
 0x121   :  { %v1525_v54 = vmax.f32 %v220_v52, 0.0  ;;  %v215_v55 = vadd.f32 %v1522_v50, %v214_v53 }
 0x122   :  { %v1017_v56 = vpop.f32.mrf.mxu0 }
 0x123   :  { %310 = vst [vmem:[#allocation13 + $0x8] sm:$0xff] %v1525_v54  ;;  %v1529_v57 = vmax.f32 %v215_v55, 0.0  ;;  %v230_v58 = vadd.f32 %v1017_v56, %v1522_v50 }
 0x124   :  { %v224_v59 = vpop.f32.mrf.mxu0 }
 0x125   :  { %309 = vst [vmem:[#allocation13] sm:$0xff] %v1529_v57  ;;  %v1533_v60 = vmax.f32 %v230_v58, 0.0  ;;  %v225_v61 = vadd.f32 %v1522_v50, %v224_v59  ;;  %v409_v63 = vadd.f32 %v1525_v54, %v1529_v57  ;;  %v408_v58 = vld [vmem:[#allocation3] sm:$0x1] }
 0x126   :  { %v1020_v62 = vpop.f32.mrf.mxu0 }
 0x127   :  { %312 = vst [vmem:[#allocation13 + $0x18] sm:$0xff] %v1533_v60  ;;  %v1539_v0 = vmax.f32 %v225_v61, 0.0  ;;  %v240_v1 = vadd.f32 %v1020_v62, %v1522_v50  ;;  %v325_v62 = vlaneseq }
 0x128   :  { %v234_v2 = vpop.f32.mrf.mxu0 }
 0x129   :  { %311 = vst [vmem:[#allocation13 + $0x10] sm:$0xff] %v1539_v0  ;;  %v410_v3 = vadd.f32 %v409_v63, %v1539_v0  ;;  %v1544_v4 = vmax.f32 %v240_v1, 0.0  ;;  %v235_v5 = vadd.f32 %v1522_v50, %v234_v2  ;;  %v326_v63 = vshrl.u32 %v325_v62, 7  ;;  %v859_v1 = vld [vmem:[%s1674_s1] ss:$0 sm:$0xff]  ;;  %v451_v2 = vld [vmem:[#allocation10 + $0x78] sm:$0xff] }
 0x12a   :  { %v1023_v6 = vpop.f32.mrf.mxu0  ;;  %v862_v62 = vld [vmem:[%s1679_s6] ss:$0 sm:$0xff]  ;;  %s1405_s6 = smov [#allocation13]  }
 0x12b   :  { %314 = vst [vmem:[#allocation13 + $0x28] sm:$0xff] %v1544_v4  ;;  %v1548_v7 = vmax.f32 %v235_v5, 0.0  ;;  %v411_v8 = vadd.f32 %v410_v3, %v1533_v60  ;;  %v250_v9 = vadd.f32 %v1023_v6, %v1522_v50  ;;  %vm332_vm1 = vcmp.eq.s32.totalorder %v326_v63, %v859_v1  ;;  %v450_v3 = vld [vmem:[#allocation10 + $0x70] sm:$0xff]  ;;  %v445_v5 = vld [vmem:[#allocation10 + $0x48] sm:$0xff]  ;;  %v444_v6 = vld [vmem:[#allocation10 + $0x40] sm:$0xff]  ;;  %s817_s30 = sshll.u32 %s1405_s6, 4  ;;  %s818_s30 = int_to_ptr.vmem [resolvable:$true] %s817_s30 }
 0x12c   :  { %v244_v10 = vpop.f32.mrf.mxu0 }
 0x12d   :  { %313 = vst [vmem:[#allocation13 + $0x20] sm:$0xff] %v1548_v7  ;;  %v412_v11 = vadd.f32 %v411_v8, %v1548_v7  ;;  %v1554_v12 = vmax.f32 %v250_v9, 0.0  ;;  %v245_v13 = vadd.f32 %v1522_v50, %v244_v10  ;;  %v442_v8 = vld [vmem:[#allocation10 + $0x30] sm:$0xff]  ;;  %v441_v9 = vld [vmem:[#allocation10 + $0x28] sm:$0xff]  ;;  %v440_v10 = vld [vmem:[#allocation10 + $0x20] sm:$0xff] }
 0x12e   :  { %v1026_v14 = vpop.f32.mrf.mxu0 }
 0x12f   :  { %316 = vst [vmem:[#allocation13 + $0x38] sm:$0xff] %v1554_v12  ;;  %v1558_v15 = vmax.f32 %v245_v13, 0.0  ;;  %v413_v16 = vadd.f32 %v412_v11, %v1544_v4  ;;  %v260_v17 = vadd.f32 %v1026_v14, %v1522_v50  ;;  %v439_v11 = vld [vmem:[#allocation10 + $0x18] sm:$0xff]  ;;  %v437_v13 = vld [vmem:[#allocation10 + $0x8] sm:$0xff]  ;;  %v436_v14 = vld [vmem:[#allocation10] sm:$0xff] }
 0x130   :  { %v254_v18 = vpop.f32.mrf.mxu0 }
 0x131   :  { %315 = vst [vmem:[#allocation13 + $0x30] sm:$0xff] %v1558_v15  ;;  %v414_v19 = vadd.f32 %v413_v16, %v1558_v15  ;;  %v302_v20 = vmax.f32 %v260_v17, 0.0  ;;  %v255_v21 = vadd.f32 %v1522_v50, %v254_v18  ;;  %v666_v16 = vld [vmem:[#allocation12 + $0xf0] sm:$0xff]  ;;  %v665_v18 = vld [vmem:[#allocation12 + $0xe8] sm:$0xff] }
 0x132   :  { %v1029_v22 = vpop.f32.mrf.mxu0 }
 0x133   :  { %318 = vst [vmem:[#allocation13 + $0x48] sm:$0xff] %v302_v20  ;;  %v301_v23 = vmax.f32 %v255_v21, 0.0  ;;  %v415_v24 = vadd.f32 %v414_v19, %v1554_v12  ;;  %v270_v25 = vadd.f32 %v1029_v22, %v1522_v50  ;;  %v663_v21 = vld [vmem:[#allocation12 + $0xd8] sm:$0xff] }
 0x134   :  { %v264_v26 = vpop.f32.mrf.mxu0  ;;  %v651_v22 = vld [vmem:[#allocation12 + $0x78] sm:$0xff] }
 0x135   :  { %317 = vst [vmem:[#allocation13 + $0x40] sm:$0xff] %v301_v23  ;;  %v416_v27 = vadd.f32 %v415_v24, %v301_v23  ;;  %v304_v28 = vmax.f32 %v270_v25, 0.0  ;;  %v265_v29 = vadd.f32 %v1522_v50, %v264_v26  ;;  %v650_v24 = vld [vmem:[#allocation12 + $0x70] sm:$0xff]  ;;  %v649_v26 = vld [vmem:[#allocation12 + $0x68] sm:$0xff] }
 0x136   :  { %v1032_v30 = vpop.f32.mrf.mxu0 }
 0x137   :  { %320 = vst [vmem:[#allocation13 + $0x58] sm:$0xff] %v304_v28  ;;  %v303_v31 = vmax.f32 %v265_v29, 0.0  ;;  %v417_v33 = vadd.f32 %v416_v27, %v302_v20  ;;  %v280_v34 = vadd.f32 %v1032_v30, %v1522_v50  ;;  %v648_v27 = vld [vmem:[#allocation12 + $0x60] sm:$0xff]  ;;  %v646_v29 = vld [vmem:[#allocation12 + $0x50] sm:$0xff]  ;;  %v645_v30 = vld [vmem:[#allocation12 + $0x48] sm:$0xff] }
 0x138   :  { %v274_v35 = vpop.f32.mrf.mxu0 }
 0x139   :  { %319 = vst [vmem:[#allocation13 + $0x50] sm:$0xff] %v303_v31  ;;  %v418_v36 = vadd.f32 %v417_v33, %v303_v31  ;;  %v306_v37 = vmax.f32 %v280_v34, 0.0  ;;  %v275_v38 = vadd.f32 %v1522_v50, %v274_v35  ;;  %v643_v33 = vld [vmem:[#allocation12 + $0x38] sm:$0xff]  ;;  %v624_v34 = vld [vmem:[%s1677_s4] sm:$0x1] }
 0x13a   :  { %v1035_v39 = vpop.f32.mrf.mxu0  ;;  %v642_v35 = vld [vmem:[#allocation12 + $0x30] sm:$0xff] }
 0x13b   :  { %322 = vst [vmem:[#allocation13 + $0x68] sm:$0xff] %v306_v37  ;;  %v305_v40 = vmax.f32 %v275_v38, 0.0  ;;  %v419_v41 = vadd.f32 %v418_v36, %v304_v28  ;;  %v290_v42 = vadd.f32 %v1035_v39, %v1522_v50  ;;  %v641_v36 = vld [vmem:[#allocation12 + $0x28] sm:$0xff]  ;;  %v640_v38 = vld [vmem:[#allocation12 + $0x20] sm:$0xff]  ;;  %v639_v39 = vld [vmem:[#allocation12 + $0x18] sm:$0xff] }
 0x13c   :  { %v284_v43 = vpop.f32.mrf.mxu0 }
 0x13d   :  { %321 = vst [vmem:[#allocation13 + $0x60] sm:$0xff] %v305_v40  ;;  %v420_v44 = vadd.f32 %v419_v41, %v305_v40  ;;  %v308_v45 = vmax.f32 %v290_v42, 0.0  ;;  %v285_v46 = vadd.f32 %v1522_v50, %v284_v43  ;;  %v638_v42 = vld [vmem:[#allocation12 + $0x10] sm:$0xff]  ;;  %v637_v43 = vld [vmem:[#allocation12 + $0x8] sm:$0xff] }
 0x13e   :  { %v1617_v17 = vpop.f32.mrf.mxu0 }
 0x13f   :  { %324 = vst [vmem:[#allocation13 + $0x78] sm:$0xff] %v308_v45  ;;  %v307_v47 = vmax.f32 %v285_v46, 0.0  ;;  %v421_v48 = vadd.f32 %v420_v44, %v306_v37  ;;  %1037 = vmatpush3.msra.mxu1 %v308_v45 }
 0x140   :  { %1038 = vmatprep.subr.mxu1 %v1401_v32  ;;  %v1105_v19 = vpop.f32.mrf.mxu0 }
 0x141   :  { %323 = vst [vmem:[#allocation13 + $0x70] sm:$0xff] %v307_v47  ;;  %v422_v49 = vadd.f32 %v421_v48, %v307_v47  ;;  %1039 = vmatpush3.msra.mxu1 %v307_v47  ;;  %v662_v47 = vld [vmem:[#allocation12 + $0xd0] sm:$0xff]  ;;  %v661_v48 = vld [vmem:[#allocation12 + $0xc8] sm:$0xff] }
 0x142   :  { %1040 = vmatprep.subr.mxu1 %v1401_v32 }
 0x143   :  { %v423_v51 = vadd.f32 %v422_v49, %v308_v45  ;;  %1041 = vmatpush3.msra.mxu1 %v306_v37  ;;  %v625_v37 = vmax.f32 %v624_v34, 0.0  ;;  %v636_v45 = vld [vmem:[#allocation12] sm:$0xff] }
 0x144   :  { %1042 = vmatprep.subr.mxu1 %v1401_v32  ;;  %v660_v49 = vld [vmem:[#allocation12 + $0xc0] sm:$0xff] }
 0x145   :  { %v424_v52 = vrot.slane %v423_v51, 4  ;;  %1043 = vmatpush3.msra.mxu1 %v305_v40  ;;  %v626_v40 = vmul.f32 112.0, %v625_v37 }
 0x146   :  { %1044 = vmatprep.subr.mxu1 %v1401_v32 }
 0x147   :  { %v425_v50 = vadd.f32 %v424_v52, %v423_v51  ;;  %1045 = vmatpush3.msra.mxu1 %v304_v28  ;;  %v647_v28 = vld [vmem:[#allocation12 + $0x58] sm:$0xff]  ;;  %v658_v52 = vld [vmem:[#allocation12 + $0xb0] sm:$0xff] }
 0x148   :  { %1046 = vmatprep.subr.mxu1 %v1401_v32  ;;  %v659_v51 = vld [vmem:[#allocation12 + $0xb8] sm:$0xff] }
 0x149   :  { %v426_v53 = vrot.slane %v425_v50, 2  ;;  %1047 = vmatpush3.msra.mxu1 %v303_v31  ;;  %v644_v31 = vld [vmem:[#allocation12 + $0x40] sm:$0xff] }
 0x14a   :  { %1048 = vmatprep.subr.mxu1 %v1401_v32 }
 0x14b   :  { %v427_v55 = vadd.f32 %v426_v53, %v425_v50  ;;  %1049 = vmatpush3.msra.mxu1 %v302_v20  ;;  %v664_v20 = vld [vmem:[#allocation12 + $0xe0] sm:$0xff]  ;;  %v657_v50 = vld [vmem:[#allocation12 + $0xa8] sm:$0xff] }
 0x14c   :  { %1050 = vmatprep.subr.mxu1 %v1401_v32  ;;  %v656_v53 = vld [vmem:[#allocation12 + $0xa0] sm:$0xff] }
 0x14d   :  { %v428_v56 = vrot.slane %v427_v55, 1  ;;  %1051 = vmatpush3.msra.mxu1 %v301_v23 }
 0x14e   :  { %1052 = vmatprep.subr.mxu1 %v1401_v32 }
 0x14f   :  { %v429_v59 = vadd.f32 %v428_v56, %v427_v55  ;;  %1053 = vmatpush3.msra.mxu1 %v1554_v12  ;;  %v438_v12 = vld [vmem:[#allocation10 + $0x10] sm:$0xff]  ;;  %v655_v55 = vld [vmem:[#allocation12 + $0x98] sm:$0xff] }
 0x150   :  { %1054 = vmatprep.subr.mxu1 %v1401_v32  ;;  %v654_v56 = vld [vmem:[#allocation12 + $0x90] sm:$0xff] }
 0x151   :  { %v430_v61 = vadd.f32 %v429_v59, %v408_v58  ;;  %1055 = vmatpush3.msra.mxu1 %v1558_v15  ;;  %v667_v15 = vld [vmem:[#allocation12 + $0xf8] sm:$0xff]  ;;  %v653_v58 = vld [vmem:[#allocation12 + $0x88] sm:$0xff]  ;;  %v652_v59 = vld [vmem:[#allocation12 + $0x80] sm:$0xff] }
 0x152   :  { %1056 = vmatprep.subr.mxu1 %v1401_v32  ;;  %1142 = vmatpush3.msra.mxu0 %v667_v15 }
 0x153   :  { %431 = vst [vmem:[#allocation3] sm:$0x1] %v430_v61  ;;  %1057 = vmatpush3.msra.mxu1 %v1544_v4  ;;  %v446_v4 = vld [vmem:[#allocation10 + $0x50] sm:$0xff]  ;;  %1143 = vmatprep.subr.mxu0 %v1401_v32 }
 0x154   :  { %1058 = vmatprep.subr.mxu1 %v1401_v32  ;;  %1144 = vmatpush3.msra.mxu0 %v666_v16 }
 0x155   :  { %1059 = vmatpush3.msra.mxu1 %v1548_v7  ;;  %v443_v7 = vld [vmem:[#allocation10 + $0x38] sm:$0xff]  ;;  %1145 = vmatprep.subr.mxu0 %v1401_v32 }
 0x156   :  { %1060 = vmatprep.subr.mxu1 %v1401_v32  ;;  %1146 = vmatpush3.msra.mxu0 %v665_v18 }
 0x157   :  { %1061 = vmatpush3.msra.mxu1 %v1533_v60  ;;  %v1403_v60 = vmov 1.0   ;;  %1147 = vmatprep.subr.mxu0 %v1401_v32 }
 0x158   :  { %1062 = vmatprep.subr.mxu1 %v1401_v32  ;;  %1148 = vmatpush3.msra.mxu0 %v664_v20 }
 0x159   :  { %1063 = vmatpush3.msra.mxu1 %v1539_v0  ;;  %v449_v0 = vld [vmem:[#allocation10 + $0x68] sm:$0xff]  ;;  %1149 = vmatprep.subr.mxu0 %v1401_v32 }
 0x15a   :  { %1064 = vmatprep.subr.mxu1 %v1401_v32  ;;  %1150 = vmatpush3.msra.mxu0 %v663_v21  ;;  %v623_v41 = vld [vmem:[#allocation3] sm:$0x1] }
 0x15b   :  { %1065 = vmatpush3.msra.mxu1 %v1525_v54  ;;  %v448_v54 = vld [vmem:[#allocation10 + $0x60] sm:$0xff]  ;;  %1151 = vmatprep.subr.mxu0 %v1401_v32  ;;  %v627_v44 = vsub.f32 %v623_v41, %v626_v40 }
 0x15c   :  { %1066 = vmatprep.subr.mxu1 %v1401_v32  ;;  %1152 = vmatpush3.msra.mxu0 %v662_v47 }
 0x15d   :  { %1067 = vmatpush3.msra.mxu1 %v1529_v57  ;;  %v447_v57 = vld [vmem:[#allocation10 + $0x58] sm:$0xff]  ;;  %v628_v46 = vmul.f32 0.0625, %v627_v44  ;;  %1153 = vmatprep.subr.mxu0 %v1401_v32 }
 0x15e   :  { %1069 = vmatmul.mubr.msk.f32.vlgmr.msra.gmra.mxu1 %vm332_vm1, %v1403_v60  ;;  %1106 = vmatprep.subr.mxu1 %v1401_v32 }
 0x15f   :  { %1107 = vmatpush3.msra.mxu1 %v451_v2  ;;  %1138 = vmatprep.mubr.msk.f32.mxu1 %vm1402_vm0, %v1401_v32 }
 0x160   :  { %1108 = vmatprep.subr.mxu1 %v1401_v32  ;;  %1154 = vmatpush3.msra.mxu0 %v661_v48 }
 0x161   :  { %1109 = vmatpush3.msra.mxu1 %v450_v3  ;;  %1155 = vmatprep.subr.mxu0 %v1401_v32 }
 0x162   :  { %1110 = vmatprep.subr.mxu1 %v1401_v32  ;;  %1156 = vmatpush3.msra.mxu0 %v660_v49 }
 0x163   :  { %1111 = vmatpush3.msra.mxu1 %v449_v0  ;;  %1157 = vmatprep.subr.mxu0 %v1401_v32 }
 0x164   :  { %1112 = vmatprep.subr.mxu1 %v1401_v32  ;;  %1158 = vmatpush3.msra.mxu0 %v659_v51 }
 0x165   :  { %1113 = vmatpush3.msra.mxu1 %v448_v54  ;;  %1159 = vmatprep.subr.mxu0 %v1401_v32 }
 0x166   :  { %1114 = vmatprep.subr.mxu1 %v1401_v32  ;;  %1160 = vmatpush3.msra.mxu0 %v658_v52 }
 0x167   :  { %1115 = vmatpush3.msra.mxu1 %v447_v57  ;;  %1161 = vmatprep.subr.mxu0 %v1401_v32 }
 0x168   :  { %1116 = vmatprep.subr.mxu1 %v1401_v32  ;;  %1162 = vmatpush3.msra.mxu0 %v657_v50 }
 0x169   :  { %1117 = vmatpush3.msra.mxu1 %v446_v4  ;;  %1163 = vmatprep.subr.mxu0 %v1401_v32 }
 0x16a   :  { %1118 = vmatprep.subr.mxu1 %v1401_v32  ;;  %1164 = vmatpush3.msra.mxu0 %v656_v53 }
 0x16b   :  { %1119 = vmatpush3.msra.mxu1 %v445_v5  ;;  %1165 = vmatprep.subr.mxu0 %v1401_v32 }
 0x16c   :  { %1120 = vmatprep.subr.mxu1 %v1401_v32  ;;  %1166 = vmatpush3.msra.mxu0 %v655_v55 }
 0x16d   :  { %1121 = vmatpush3.msra.mxu1 %v444_v6  ;;  %1167 = vmatprep.subr.mxu0 %v1401_v32 }
 0x16e   :  { %1122 = vmatprep.subr.mxu1 %v1401_v32  ;;  %1168 = vmatpush3.msra.mxu0 %v654_v56 }
 0x16f   :  { %1123 = vmatpush3.msra.mxu1 %v443_v7  ;;  %1169 = vmatprep.subr.mxu0 %v1401_v32 }
 0x170   :  { %1124 = vmatprep.subr.mxu1 %v1401_v32  ;;  %1170 = vmatpush3.msra.mxu0 %v653_v58 }
 0x171   :  { %1125 = vmatpush3.msra.mxu1 %v442_v8  ;;  %1171 = vmatprep.subr.mxu0 %v1401_v32 }
 0x172   :  { %1126 = vmatprep.subr.mxu1 %v1401_v32  ;;  %1172 = vmatpush3.msra.mxu0 %v652_v59 }
 0x173   :  { %1127 = vmatpush3.msra.mxu1 %v441_v9 }
 0x174   :  { %1128 = vmatprep.subr.mxu1 %v1401_v32 }
 0x175   :  { %1129 = vmatpush3.msra.mxu1 %v440_v10 }
 0x176   :  { %1130 = vmatprep.subr.mxu1 %v1401_v32 }
 0x177   :  { %1131 = vmatpush3.msra.mxu1 %v439_v11 }
 0x178   :  { %1132 = vmatprep.subr.mxu1 %v1401_v32 }
 0x179   :  { %1133 = vmatpush3.msra.mxu1 %v438_v12 }
 0x17a   :  { %1134 = vmatprep.subr.mxu1 %v1401_v32 }
 0x17b   :  { %1135 = vmatpush3.msra.mxu1 %v437_v13 }
 0x17c   :  { %1136 = vmatprep.subr.mxu1 %v1401_v32 }
 0x17d   :  { %1137 = vmatpush3.msra.mxu1 %v436_v14 }
 0x17e   :  { %1176 = vmatprep.subr.mxu1 %v1401_v32 }
 0x21e   :  { %v402_v23 = vpop.f32.mrf.mxu1 }
 0x21f   :  { %1139 = vmatmul.mubr.f32.vlgmr.msra.gmra.mxu1 %v402_v23 }
 0x220   :  { %1177 = vmatpush3.msra.mxu1 %v651_v22  ;;  %v1070_v25 = vpop.f32.mrf.mxu1  ;;  %1208 = vmatprep.mubr.msk.f32.mxu1 %vm1402_vm0, %v1401_v32 }
 0x221   :  { %1178 = vmatprep.subr.mxu1 %v1401_v32 }
 0x222   :  { %1179 = vmatpush3.msra.mxu1 %v650_v24 }
 0x223   :  { %1180 = vmatprep.subr.mxu1 %v1401_v32 }
 0x224   :  { %1181 = vmatpush3.msra.mxu1 %v649_v26 }
 0x225   :  { %1182 = vmatprep.subr.mxu1 %v1401_v32 }
 0x226   :  { %1183 = vmatpush3.msra.mxu1 %v648_v27 }
 0x227   :  { %1184 = vmatprep.subr.mxu1 %v1401_v32 }
 0x228   :  { %1185 = vmatpush3.msra.mxu1 %v647_v28 }
 0x229   :  { %1186 = vmatprep.subr.mxu1 %v1401_v32 }
 0x22a   :  { %1187 = vmatpush3.msra.mxu1 %v646_v29 }
 0x22b   :  { %1188 = vmatprep.subr.mxu1 %v1401_v32 }
 0x22c   :  { %1189 = vmatpush3.msra.mxu1 %v645_v30 }
 0x22d   :  { %1190 = vmatprep.subr.mxu1 %v1401_v32 }
 0x22e   :  { %1191 = vmatpush3.msra.mxu1 %v644_v31 }
 0x22f   :  { %1192 = vmatprep.subr.mxu1 %v1401_v32 }
 0x230   :  { %1193 = vmatpush3.msra.mxu1 %v643_v33 }
 0x231   :  { %1194 = vmatprep.subr.mxu1 %v1401_v32 }
 0x232   :  { %1195 = vmatpush3.msra.mxu1 %v642_v35 }
 0x233   :  { %1196 = vmatprep.subr.mxu1 %v1401_v32 }
 0x234   :  { %1197 = vmatpush3.msra.mxu1 %v641_v36 }
 0x235   :  { %1198 = vmatprep.subr.mxu1 %v1401_v32 }
 0x236   :  { %1199 = vmatpush3.msra.mxu1 %v640_v38 }
 0x237   :  { %1200 = vmatprep.subr.mxu1 %v1401_v32 }
 0x238   :  { %1201 = vmatpush3.msra.mxu1 %v639_v39 }
 0x239   :  { %1202 = vmatprep.subr.mxu1 %v1401_v32 }
 0x23a   :  { %1203 = vmatpush3.msra.mxu1 %v638_v42 }
 0x23b   :  { %1204 = vmatprep.subr.mxu1 %v1401_v32 }
 0x23c   :  { %1205 = vmatpush3.msra.mxu1 %v637_v43 }
 0x23d   :  { %1206 = vmatprep.subr.mxu1 %v1401_v32 }
 0x23e   :  { %1207 = vmatpush3.msra.mxu1 %v636_v45 }
 0x23f   :  { %1209 = vmatmul.mubr.f32.vlgmr.msra.gmra.mxu1 %v628_v46 }
 0x2df   :  { %v605_v61 = vpop.f32.mrf.mxu1 }
 0x2e0   :  { %v606_v63 = vadd.f32 %v605_v61, %v1617_v17 }
 0x2e1   :  { %v1140_v1 = vpop.f32.mrf.mxu1 }
 0x2e2   :  { %v616_v2 = vadd.f32 %v862_v62, %v606_v63 }
 0x2e4   :  { %v617_v60 = vmax.f32 %v616_v2, 0.0 }
 0x2e6   :  { %v629_v3 = vrot.slane %v617_v60, 4  ;;  %622 = vst [vmem:[#allocation14] sm:$0xff] %v617_v60 }
 0x2e8   :  { %v630_v0 = vadd.f32 %v629_v3, %v617_v60 }
 0x2ea   :  { %v631_v54 = vrot.slane %v630_v0, 2 }
 0x2ec   :  { %v632_v57 = vadd.f32 %v631_v54, %v630_v0 }
 0x2ee   :  { %v633_v4 = vrot.slane %v632_v57, 1 }
 0x2f0   :  { %v634_v5 = vadd.f32 %v633_v4, %v632_v57 }
 0x2f2   :  { %v635_v6 = vmul.f32 0.125, %v634_v5 }
 0x2f4   :  { %1174 = vmatmul.mubr.f32.vlgmr.msra.gmra.mxu0 %v635_v6 }
 0x2ff   :  { %v804_v32 = vpop.f32.mrf.mxu1 }
 0x301   :  { %v1210_v7 = vpop.f32.mrf.mxu1 }
 0x302   :  { %1335 = shalt.err (!%p1332_p1)
}
 0x303   :  { %833 = dma.vmem_to_hbm [thread:$0]  %s831_s29, 128, %s1683_s10, [#allocation15]  }
 0x304   :  { %s1344_s14 = scalar_lea.vmem %s818_s30, 2048  ;;  %p1349_p3 = scmp.lt.s32.totalorder %s818_s30, %s818_s30 }
 0x305   :  { %p1345_p2 = scmp.ne.s32.totalorder %s818_s30, %s1344_s14  ;;  %p1350_p4 = scmp.lt.s32.totalorder %s1344_s14, %s1344_s14 }
 0x307   :  { %p1351_p5 = por %p1350_p4, %p1349_p3 }
 0x309   :  { %p1352_p6 = pnand %p1351_p5, %p1345_p2 }
 0x30b   :  { %1355 = shalt.err (!%p1352_p6)
}
 0x30c   :  { %823 = dma.vmem_to_hbm [thread:$0]  %s818_s30, 2048, %s1682_s9, [#allocation6], %s1397_s27, %s1397_s27, %s1398_s28  }
 0x30d   :  { %v808_v9 = vld [vmem:[%s1681_s8] sm:$0x1]  ;;  %s1406_s10 = smov [#allocation16]  }
 0x30e   :  { %s840_s18 = sshll.u32 %s1406_s10, 4  ;;  %s841_s18 = int_to_ptr.vmem [resolvable:$true] %s840_s18 }
 0x30f   :  { %s1364_s19 = scalar_lea.vmem %s841_s18, 16  ;;  %s1368_s0 = scalar_lea.vmem %s841_s18, 32 }
 0x310   :  { %p1365_p7 = scmp.ne.s32.totalorder %s841_s18, %s1364_s19  ;;  %p1369_p8 = scmp.lt.s32.totalorder %s841_s18, %s841_s18 }
 0x311   :  { %p1370_p9 = scmp.lt.s32.totalorder %s1368_s0, %s1364_s19 }
 0x313   :  { %p1371_p10 = por %p1370_p9, %p1369_p8 }
 0x315   :  { %p1372_p11 = pnand %p1371_p10, %p1365_p7 }
 0x3b4   :  { %v734_v8 = vpop.f32.mrf.mxu0 }
 0x3b5   :  { %v805_v10 = vadd.f32 %v804_v32, %v734_v8 }
 0x3b6   :  { %v1175_v11 = vpop.f32.mrf.mxu0 }
 0x3b7   :  { %v809_v12 = vadd.f32 %v808_v9, %v805_v10 }
 0x3b9   :  { %v810_v13 = vmax.f32 %v809_v12, 0.0 }
 0x3bb   :  { %811 = vst [vmem:[#allocation16] sm:$0x1] %v810_v13 }
 0x3bc   :  { %1375 = shalt.err (!%p1372_p11)
}
 0x3bd   :  { %843 = dma.vmem_to_hbm [thread:$0]  %s841_s18, 16, %s1684_s11, [#allocation15]  }
 0x3be   :  { %1390 = dma.done.wait [#allocation6], 2048  }
 0x3bf   :  { %1391 = vsyncadd [#allocation6], 4294965248 }
 0x3c0   :  { %1392 = dma.done.wait [#allocation15], 144  }
 0x3c1   :  { %1393 = vsyncadd [#allocation15], 4294967152 }
 0x3c2   :  { %853 = vsyncpa [#allocation5], 1 }
 0x3c3   :  { %854 = vsyncpa [#allocation8], 1 }
 0x3c4   :  { %855 = vsyncpa [#allocation11], 1 }
 0x3c5   :  { %856 = vsyncpa [#allocation6], 1 }
 0x3c6   :  { %857 = vsyncpa [#allocation15], 1 }

// kernel: tpu_custom_call.1
= control target key start
LH: loop header
LB: loop body
LE: loop exit
PB: predicated region body
PF: predicated region fallthrough
CT: control target
= control target key end

     0   :  { %17 = vsyncpa [#allocation5], 0  ;;  %s1673_s0 = inlined_call_operand.hbm [shape: f32[128,128], index: 0, kind: input, shape index: {}]   ;;  %s1674_s1 = inlined_call_operand.vmem [shape: s32[1,128], index: 1, kind: input, shape index: {}]   ;;  %s1675_s2 = inlined_call_operand.hbm [shape: f32[8,128], index: 2, kind: input, shape index: {}]   ;;  %s1676_s3 = inlined_call_operand.hbm [shape: f32[128,128], index: 3, kind: input, shape index: {}]   ;;  %s1677_s4 = inlined_call_operand.vmem [shape: f32[1,128], index: 4, kind: input, shape index: {}]   ;;  %s1678_s5 = inlined_call_operand.hbm [shape: f32[256,128], index: 5, kind: input, shape index: {}]   ;;  %s1679_s6 = inlined_call_operand.vmem [shape: f32[1,128], index: 6, kind: input, shape index: {}]   ;;  %s1680_s7 = inlined_call_operand.hbm [shape: f32[256,128], index: 7, kind: input, shape index: {}]   ;;  %s1681_s8 = inlined_call_operand.vmem [shape: f32[1,128], index: 8, kind: input, shape index: {}]   ;;  %s1682_s9 = inlined_call_operand.hbm [shape: f32[128,128], index: 9, kind: output, shape index: {0}]   ;;  %s1683_s10 = inlined_call_operand.hbm [shape: f32[8,128], index: 10, kind: output, shape index: {1}]   ;;  %s1684_s11 = inlined_call_operand.hbm [shape: f32[1,128], index: 11, kind: output, shape index: {2}]  }
   0x1   :  { %18 = vsyncpa [#allocation8], 0 }
   0x2   :  { %19 = vsyncpa [#allocation11], 0 }
   0x3   :  { %20 = vsyncpa [#allocation6], 0 }
   0x4   :  { %21 = vsyncpa [#allocation15], 0  ;;  %s1394_s17 = smov [#allocation7]  }
   0x5   :  { %s42_s18 = sshll.u32 %s1394_s17, 4  ;;  %s43_s18 = int_to_ptr.vmem [resolvable:$true] %s42_s18 }
   0x6   :  { %s1232_s19 = scalar_lea.vmem %s43_s18, 128  ;;  %p1237_p1 = scmp.lt.s32.totalorder %s43_s18, %s43_s18 }
   0x7   :  { %p1233_p0 = scmp.ne.s32.totalorder %s43_s18, %s1232_s19  ;;  %p1238_p2 = scmp.lt.s32.totalorder %s1232_s19, %s1232_s19 }
   0x9   :  { %p1239_p3 = por %p1238_p2, %p1237_p1 }
   0xb   :  { %p1240_p4 = pnand %p1239_p3, %p1233_p0 }
   0xd   :  { %1243 = shalt.err (!%p1240_p4)
}
   0xe   :  { %45 = dma.hbm_to_vmem [thread:$0]  %s1675_s2, 128, %s43_s18, [#allocation8]  }
   0xf   :  { %s1395_s22 = smov [#allocation10]   ;;  %s1396_s24 = smov [#allocation4]  }
  0x10   :  { %s65_s23 = sshll.u32 %s1395_s22, 4  ;;  %s27_s25 = sshll.u32 %s1396_s24, 4  ;;  %s66_s23 = int_to_ptr.vmem [resolvable:$true] %s65_s23  ;;  %s28_s25 = int_to_ptr.vmem [resolvable:$true] %s27_s25 }
  0x11   :  { %s1252_s26 = scalar_lea.vmem %s66_s23, 4096  ;;  %p1257_p6 = scmp.lt.s32.totalorder %s66_s23, %s66_s23 }
  0x12   :  { %p1253_p5 = scmp.ne.s32.totalorder %s66_s23, %s1252_s26  ;;  %p1258_p7 = scmp.lt.s32.totalorder %s1252_s26, %s1252_s26 }
  0x14   :  { %p1259_p8 = por %p1258_p7, %p1257_p6 }
  0x16   :  { %p1260_p9 = pnand %p1259_p8, %p1253_p5 }
  0x18   :  { %1263 = shalt.err (!%p1260_p9)
}
  0x19   :  { %s1397_s27 = smov 128   ;;  %s1398_s28 = smov 8  }
  0x1a   :  { %71 = dma.hbm_to_vmem [thread:$0]  %s1678_s5, 4096, %s66_s23, [#allocation11], %s1397_s27, %s1397_s27, %s1398_s28  }
  0x1b   :  { %s1272_s2 = scalar_lea.vmem %s28_s25, 2048  ;;  %p1277_p11 = scmp.lt.s32.totalorder %s28_s25, %s28_s25 }
  0x1c   :  { %p1273_p10 = scmp.ne.s32.totalorder %s28_s25, %s1272_s2  ;;  %p1278_p12 = scmp.lt.s32.totalorder %s1272_s2, %s1272_s2 }
  0x1e   :  { %p1279_p13 = por %p1278_p12, %p1277_p11 }
  0x20   :  { %p1280_p0 = pnand %p1279_p13, %p1273_p10 }
  0x22   :  { %1283 = shalt.err (!%p1280_p0)
}
  0x23   :  { %33 = dma.hbm_to_vmem [thread:$0]  %s1673_s0, 2048, %s28_s25, [#allocation5], %s1397_s27, %s1397_s27, %s1398_s28  }
  0x24   :  { %s1399_s14 = smov [#allocation9]   ;;  %s1400_s16 = smov [#allocation12]  }
  0x25   :  { %s51_s15 = sshll.u32 %s1399_s14, 4  ;;  %s79_s5 = sshll.u32 %s1400_s16, 4  ;;  %s52_s15 = int_to_ptr.vmem [resolvable:$true] %s51_s15  ;;  %s80_s5 = int_to_ptr.vmem [resolvable:$true] %s79_s5 }
  0x26   :  { %s1292_s17 = scalar_lea.vmem %s52_s15, 2048  ;;  %p1297_p2 = scmp.lt.s32.totalorder %s52_s15, %s52_s15 }
  0x27   :  { %p1293_p1 = scmp.ne.s32.totalorder %s52_s15, %s1292_s17  ;;  %p1298_p3 = scmp.lt.s32.totalorder %s1292_s17, %s1292_s17 }
  0x29   :  { %p1299_p4 = por %p1298_p3, %p1297_p2 }
  0x2b   :  { %p1300_p5 = pnand %p1299_p4, %p1293_p1 }
  0x2d   :  { %1303 = shalt.err (!%p1300_p5)
}
  0x2e   :  { %57 = dma.hbm_to_vmem [thread:$0]  %s1676_s3, 2048, %s52_s15, [#allocation8], %s1397_s27, %s1397_s27, %s1398_s28  }
  0x2f   :  { %s1312_s0 = scalar_lea.vmem %s80_s5, 4096  ;;  %p1317_p7 = scmp.lt.s32.totalorder %s80_s5, %s80_s5 }
  0x30   :  { %p1313_p6 = scmp.ne.s32.totalorder %s80_s5, %s1312_s0  ;;  %p1318_p8 = scmp.lt.s32.totalorder %s1312_s0, %s1312_s0 }
  0x32   :  { %p1319_p9 = por %p1318_p8, %p1317_p7 }
  0x34   :  { %p1320_p10 = pnand %p1319_p9, %p1313_p6 }
  0x36   :  { %1323 = shalt.err (!%p1320_p10)
}
  0x37   :  { %85 = dma.hbm_to_vmem [thread:$0]  %s1680_s7, 4096, %s80_s5, [#allocation11], %s1397_s27, %s1397_s27, %s1398_s28  }
  0x38   :  { %1384 = dma.done.wait [#allocation5], 2048  }
  0x39   :  { %1385 = vsyncadd [#allocation5], 4294965248 }
  0x3a   :  { %1386 = dma.done.wait [#allocation8], 2176  }
  0x3b   :  { %1387 = vsyncadd [#allocation8], 4294965120 }
  0x3c   :  { %1388 = dma.done.wait [#allocation11], 8192  }
  0x3d   :  { %1389 = vsyncadd [#allocation11], 4294959104  ;;  %v140_v0 = vld [vmem:[#allocation9 + $0x78] sm:$0xff]  ;;  %v139_v1 = vld [vmem:[#allocation9 + $0x70] sm:$0xff]  ;;  %v1401_v32 = vmov 0.0   ;;  %vm1402_vm0 = vmmov 0  }
  0x3e   :  { %980 = vmatprep.subr.mxu0 %v140_v0  ;;  %v138_v2 = vld [vmem:[#allocation9 + $0x68] sm:$0xff]  ;;  %v137_v3 = vld [vmem:[#allocation9 + $0x60] sm:$0xff]  ;;  %v109_v4 = vld [vmem:[#allocation4] sm:$0xff]  ;;  %108 = vst [vmem:[#allocation3] sm:$0x1] %v1401_v32  ;;  %1036 = vmatprep.subr.mxu1 %v1401_v32  ;;  %s1404_s26 = smov [#allocation14]  }
  0x3f   :  { %981 = vmatpush3.msra.mxu0 %v140_v0  ;;  %v136_v5 = vld [vmem:[#allocation9 + $0x58] sm:$0xff]  ;;  %1012 = vmatprep.mubr.f32.mxu0 %v109_v4  ;;  %v135_v6 = vld [vmem:[#allocation9 + $0x50] sm:$0xff]  ;;  %v134_v7 = vld [vmem:[#allocation9 + $0x48] sm:$0xff]  ;;  %s830_s29 = sshll.u32 %s1404_s26, 4  ;;  %s831_s29 = int_to_ptr.vmem [resolvable:$true] %s830_s29 }
  0x40   :  { %982 = vmatprep.subr.mxu0 %v139_v1  ;;  %v133_v8 = vld [vmem:[#allocation9 + $0x40] sm:$0xff]  ;;  %v132_v9 = vld [vmem:[#allocation9 + $0x38] sm:$0xff]  ;;  %v131_v10 = vld [vmem:[#allocation9 + $0x30] sm:$0xff]  ;;  %1068 = vmatprep.mubr.msk.f32.mxu1 %vm1402_vm0, %v1401_v32  ;;  %s1324_s2 = scalar_lea.vmem %s831_s29, 128  ;;  %p1329_p12 = scmp.lt.s32.totalorder %s831_s29, %s831_s29 }
  0x41   :  { %983 = vmatpush3.msra.mxu0 %v139_v1  ;;  %v130_v11 = vld [vmem:[#allocation9 + $0x28] sm:$0xff]  ;;  %v129_v12 = vld [vmem:[#allocation9 + $0x20] sm:$0xff]  ;;  %v128_v13 = vld [vmem:[#allocation9 + $0x18] sm:$0xff]  ;;  %p1325_p11 = scmp.ne.s32.totalorder %s831_s29, %s1324_s2  ;;  %p1330_p13 = scmp.lt.s32.totalorder %s1324_s2, %s1324_s2 }
  0x42   :  { %984 = vmatprep.subr.mxu0 %v138_v2  ;;  %v127_v14 = vld [vmem:[#allocation9 + $0x10] sm:$0xff]  ;;  %v126_v15 = vld [vmem:[#allocation9 + $0x8] sm:$0xff]  ;;  %v125_v16 = vld [vmem:[#allocation9] sm:$0xff] }
  0x43   :  { %985 = vmatpush3.msra.mxu0 %v138_v2  ;;  %v110_v17 = vld [vmem:[#allocation4 + $0x8] sm:$0xff]  ;;  %v111_v18 = vld [vmem:[#allocation4 + $0x10] sm:$0xff]  ;;  %v112_v19 = vld [vmem:[#allocation4 + $0x18] sm:$0xff]  ;;  %p1331_p0 = por %p1330_p13, %p1329_p12 }
  0x44   :  { %986 = vmatprep.subr.mxu0 %v137_v3  ;;  %v113_v20 = vld [vmem:[#allocation4 + $0x20] sm:$0xff]  ;;  %v114_v21 = vld [vmem:[#allocation4 + $0x28] sm:$0xff]  ;;  %v115_v22 = vld [vmem:[#allocation4 + $0x30] sm:$0xff] }
  0x45   :  { %987 = vmatpush3.msra.mxu0 %v137_v3  ;;  %v116_v23 = vld [vmem:[#allocation4 + $0x38] sm:$0xff]  ;;  %v117_v24 = vld [vmem:[#allocation4 + $0x40] sm:$0xff]  ;;  %v118_v25 = vld [vmem:[#allocation4 + $0x48] sm:$0xff]  ;;  %p1332_p1 = pnand %p1331_p0, %p1325_p11 }
  0x46   :  { %988 = vmatprep.subr.mxu0 %v136_v5  ;;  %v119_v26 = vld [vmem:[#allocation4 + $0x50] sm:$0xff]  ;;  %v120_v27 = vld [vmem:[#allocation4 + $0x58] sm:$0xff]  ;;  %v121_v28 = vld [vmem:[#allocation4 + $0x60] sm:$0xff] }
  0x47   :  { %989 = vmatpush3.msra.mxu0 %v136_v5  ;;  %v122_v29 = vld [vmem:[#allocation4 + $0x68] sm:$0xff]  ;;  %v123_v30 = vld [vmem:[#allocation4 + $0x70] sm:$0xff]  ;;  %v124_v31 = vld [vmem:[#allocation4 + $0x78] sm:$0xff] }
  0x48   :  { %990 = vmatprep.subr.mxu0 %v135_v6  ;;  %v468_v33 = vld [vmem:[#allocation10 + $0xf8] sm:$0xff]  ;;  %v467_v34 = vld [vmem:[#allocation10 + $0xf0] sm:$0xff]  ;;  %v466_v35 = vld [vmem:[#allocation10 + $0xe8] sm:$0xff] }
  0x49   :  { %991 = vmatpush3.msra.mxu0 %v135_v6  ;;  %v465_v36 = vld [vmem:[#allocation10 + $0xe0] sm:$0xff]  ;;  %v464_v37 = vld [vmem:[#allocation10 + $0xd8] sm:$0xff]  ;;  %v463_v38 = vld [vmem:[#allocation10 + $0xd0] sm:$0xff] }
  0x4a   :  { %992 = vmatprep.subr.mxu0 %v134_v7  ;;  %v462_v39 = vld [vmem:[#allocation10 + $0xc8] sm:$0xff]  ;;  %v461_v40 = vld [vmem:[#allocation10 + $0xc0] sm:$0xff]  ;;  %v460_v41 = vld [vmem:[#allocation10 + $0xb8] sm:$0xff] }
  0x4b   :  { %993 = vmatpush3.msra.mxu0 %v134_v7  ;;  %v459_v42 = vld [vmem:[#allocation10 + $0xb0] sm:$0xff]  ;;  %v458_v43 = vld [vmem:[#allocation10 + $0xa8] sm:$0xff]  ;;  %v457_v44 = vld [vmem:[#allocation10 + $0xa0] sm:$0xff] }
  0x4c   :  { %994 = vmatprep.subr.mxu0 %v133_v8  ;;  %v456_v45 = vld [vmem:[#allocation10 + $0x98] sm:$0xff]  ;;  %v455_v46 = vld [vmem:[#allocation10 + $0x90] sm:$0xff]  ;;  %v454_v47 = vld [vmem:[#allocation10 + $0x88] sm:$0xff] }
  0x4d   :  { %995 = vmatpush3.msra.mxu0 %v133_v8  ;;  %v453_v48 = vld [vmem:[#allocation10 + $0x80] sm:$0xff]  ;;  %v452_v49 = vld [vmem:[#allocation7] sm:$0xff]  ;;  %v1522_v50 = vld [vmem:[%s1677_s4] ss:$0 sm:$0xff] }
  0x4e   :  { %996 = vmatprep.subr.mxu0 %v132_v9 }
  0x4f   :  { %997 = vmatpush3.msra.mxu0 %v132_v9 }
  0x50   :  { %998 = vmatprep.subr.mxu0 %v131_v10 }
  0x51   :  { %999 = vmatpush3.msra.mxu0 %v131_v10 }
  0x52   :  { %1000 = vmatprep.subr.mxu0 %v130_v11 }
  0x53   :  { %1001 = vmatpush3.msra.mxu0 %v130_v11 }
  0x54   :  { %1002 = vmatprep.subr.mxu0 %v129_v12 }
  0x55   :  { %1003 = vmatpush3.msra.mxu0 %v129_v12 }
  0x56   :  { %1004 = vmatprep.subr.mxu0 %v128_v13 }
  0x57   :  { %1005 = vmatpush3.msra.mxu0 %v128_v13 }
  0x58   :  { %1006 = vmatprep.subr.mxu0 %v127_v14 }
  0x59   :  { %1007 = vmatpush3.msra.mxu0 %v127_v14 }
  0x5a   :  { %1008 = vmatprep.subr.mxu0 %v126_v15 }
  0x5b   :  { %1009 = vmatpush3.msra.mxu0 %v126_v15 }
  0x5c   :  { %1010 = vmatprep.subr.mxu0 %v125_v16 }
  0x5d   :  { %1011 = vmatpush3.msra.mxu0 %v125_v16 }
  0x5e   :  { %1013 = vmatmul.mubr.f32.vlgmr.msra.gmra.mxu0 %v110_v17  ;;  %1071 = vmatprep.subr.mxu0 %v1401_v32 }
  0x5f   :  { %1015 = vmatprep.mubr.f32.mxu0 %v111_v18  ;;  %1072 = vmatpush3.msra.mxu0 %v468_v33 }
  0x60   :  { %1073 = vmatprep.subr.mxu0 %v1401_v32 }
  0x61   :  { %1074 = vmatpush3.msra.mxu0 %v467_v34 }
  0x62   :  { %1016 = vmatmul.mubr.f32.gmra.mxu0 %v112_v19  ;;  %1075 = vmatprep.subr.mxu0 %v1401_v32 }
  0x63   :  { %1018 = vmatprep.mubr.f32.mxu0 %v113_v20  ;;  %1076 = vmatpush3.msra.mxu0 %v466_v35 }
  0x64   :  { %1077 = vmatprep.subr.mxu0 %v1401_v32 }
  0x65   :  { %1078 = vmatpush3.msra.mxu0 %v465_v36 }
  0x66   :  { %1019 = vmatmul.mubr.f32.gmra.mxu0 %v114_v21  ;;  %1079 = vmatprep.subr.mxu0 %v1401_v32 }
  0x67   :  { %1021 = vmatprep.mubr.f32.mxu0 %v115_v22  ;;  %1080 = vmatpush3.msra.mxu0 %v464_v37 }
  0x68   :  { %1081 = vmatprep.subr.mxu0 %v1401_v32 }
  0x69   :  { %1082 = vmatpush3.msra.mxu0 %v463_v38 }
  0x6a   :  { %1022 = vmatmul.mubr.f32.gmra.mxu0 %v116_v23  ;;  %1083 = vmatprep.subr.mxu0 %v1401_v32 }
  0x6b   :  { %1024 = vmatprep.mubr.f32.mxu0 %v117_v24  ;;  %1084 = vmatpush3.msra.mxu0 %v462_v39 }
  0x6c   :  { %1085 = vmatprep.subr.mxu0 %v1401_v32 }
  0x6d   :  { %1086 = vmatpush3.msra.mxu0 %v461_v40 }
  0x6e   :  { %1025 = vmatmul.mubr.f32.gmra.mxu0 %v118_v25  ;;  %1087 = vmatprep.subr.mxu0 %v1401_v32 }
  0x6f   :  { %1027 = vmatprep.mubr.f32.mxu0 %v119_v26  ;;  %1088 = vmatpush3.msra.mxu0 %v460_v41 }
  0x70   :  { %1089 = vmatprep.subr.mxu0 %v1401_v32 }
  0x71   :  { %1090 = vmatpush3.msra.mxu0 %v459_v42 }
  0x72   :  { %1028 = vmatmul.mubr.f32.gmra.mxu0 %v120_v27  ;;  %1091 = vmatprep.subr.mxu0 %v1401_v32 }
  0x73   :  { %1030 = vmatprep.mubr.f32.mxu0 %v121_v28  ;;  %1092 = vmatpush3.msra.mxu0 %v458_v43 }
  0x74   :  { %1093 = vmatprep.subr.mxu0 %v1401_v32 }
  0x75   :  { %1094 = vmatpush3.msra.mxu0 %v457_v44 }
  0x76   :  { %1031 = vmatmul.mubr.f32.gmra.mxu0 %v122_v29  ;;  %1095 = vmatprep.subr.mxu0 %v1401_v32 }
  0x77   :  { %1033 = vmatprep.mubr.f32.mxu0 %v123_v30  ;;  %1096 = vmatpush3.msra.mxu0 %v456_v45 }
  0x78   :  { %1097 = vmatprep.subr.mxu0 %v1401_v32 }
  0x79   :  { %1098 = vmatpush3.msra.mxu0 %v455_v46 }
  0x7a   :  { %1034 = vmatmul.mubr.f32.gmra.mxu0 %v124_v31  ;;  %1099 = vmatprep.subr.mxu0 %v1401_v32 }
  0x7b   :  { %1103 = vmatprep.mubr.msk.f32.mxu0 %vm1402_vm0, %v1401_v32  ;;  %1100 = vmatpush3.msra.mxu0 %v454_v47 }
  0x7c   :  { %1101 = vmatprep.subr.mxu0 %v1401_v32 }
  0x7d   :  { %1102 = vmatpush3.msra.mxu0 %v453_v48 }
  0x7e   :  { %1104 = vmatmul.mubr.f32.vlgmr.msra.gmra.mxu0 %v452_v49  ;;  %1141 = vmatprep.subr.mxu0 %v1401_v32 }
  0x7f   :  { %1173 = vmatprep.mubr.msk.f32.mxu0 %vm1402_vm0, %v1401_v32 }
 0x11e   :  { %v1014_v51 = vpop.f32.mrf.mxu0 }
 0x11f   :  { %v220_v52 = vadd.f32 %v1014_v51, %v1522_v50 }
 0x120   :  { %v214_v53 = vpop.f32.mrf.mxu0 }
 0x121   :  { %v1525_v54 = vmax.f32 %v220_v52, 0.0  ;;  %v215_v55 = vadd.f32 %v1522_v50, %v214_v53 }
 0x122   :  { %v1017_v56 = vpop.f32.mrf.mxu0 }
 0x123   :  { %310 = vst [vmem:[#allocation13 + $0x8] sm:$0xff] %v1525_v54  ;;  %v1529_v57 = vmax.f32 %v215_v55, 0.0  ;;  %v230_v58 = vadd.f32 %v1017_v56, %v1522_v50 }
 0x124   :  { %v224_v59 = vpop.f32.mrf.mxu0 }
 0x125   :  { %309 = vst [vmem:[#allocation13] sm:$0xff] %v1529_v57  ;;  %v1533_v60 = vmax.f32 %v230_v58, 0.0  ;;  %v225_v61 = vadd.f32 %v1522_v50, %v224_v59  ;;  %v409_v63 = vadd.f32 %v1525_v54, %v1529_v57  ;;  %v408_v58 = vld [vmem:[#allocation3] sm:$0x1] }
 0x126   :  { %v1020_v62 = vpop.f32.mrf.mxu0 }
 0x127   :  { %312 = vst [vmem:[#allocation13 + $0x18] sm:$0xff] %v1533_v60  ;;  %v1539_v0 = vmax.f32 %v225_v61, 0.0  ;;  %v240_v1 = vadd.f32 %v1020_v62, %v1522_v50  ;;  %v325_v62 = vlaneseq }
 0x128   :  { %v234_v2 = vpop.f32.mrf.mxu0 }
 0x129   :  { %311 = vst [vmem:[#allocation13 + $0x10] sm:$0xff] %v1539_v0  ;;  %v410_v3 = vadd.f32 %v409_v63, %v1539_v0  ;;  %v1544_v4 = vmax.f32 %v240_v1, 0.0  ;;  %v235_v5 = vadd.f32 %v1522_v50, %v234_v2  ;;  %v326_v63 = vshrl.u32 %v325_v62, 7  ;;  %v859_v1 = vld [vmem:[%s1674_s1] ss:$0 sm:$0xff]  ;;  %v451_v2 = vld [vmem:[#allocation10 + $0x78] sm:$0xff] }
 0x12a   :  { %v1023_v6 = vpop.f32.mrf.mxu0  ;;  %v862_v62 = vld [vmem:[%s1679_s6] ss:$0 sm:$0xff]  ;;  %s1405_s6 = smov [#allocation13]  }
 0x12b   :  { %314 = vst [vmem:[#allocation13 + $0x28] sm:$0xff] %v1544_v4  ;;  %v1548_v7 = vmax.f32 %v235_v5, 0.0  ;;  %v411_v8 = vadd.f32 %v410_v3, %v1533_v60  ;;  %v250_v9 = vadd.f32 %v1023_v6, %v1522_v50  ;;  %vm332_vm1 = vcmp.eq.s32.totalorder %v326_v63, %v859_v1  ;;  %v450_v3 = vld [vmem:[#allocation10 + $0x70] sm:$0xff]  ;;  %v445_v5 = vld [vmem:[#allocation10 + $0x48] sm:$0xff]  ;;  %v444_v6 = vld [vmem:[#allocation10 + $0x40] sm:$0xff]  ;;  %s817_s30 = sshll.u32 %s1405_s6, 4  ;;  %s818_s30 = int_to_ptr.vmem [resolvable:$true] %s817_s30 }
 0x12c   :  { %v244_v10 = vpop.f32.mrf.mxu0 }
 0x12d   :  { %313 = vst [vmem:[#allocation13 + $0x20] sm:$0xff] %v1548_v7  ;;  %v412_v11 = vadd.f32 %v411_v8, %v1548_v7  ;;  %v1554_v12 = vmax.f32 %v250_v9, 0.0  ;;  %v245_v13 = vadd.f32 %v1522_v50, %v244_v10  ;;  %v442_v8 = vld [vmem:[#allocation10 + $0x30] sm:$0xff]  ;;  %v441_v9 = vld [vmem:[#allocation10 + $0x28] sm:$0xff]  ;;  %v440_v10 = vld [vmem:[#allocation10 + $0x20] sm:$0xff] }
 0x12e   :  { %v1026_v14 = vpop.f32.mrf.mxu0 }
 0x12f   :  { %316 = vst [vmem:[#allocation13 + $0x38] sm:$0xff] %v1554_v12  ;;  %v1558_v15 = vmax.f32 %v245_v13, 0.0  ;;  %v413_v16 = vadd.f32 %v412_v11, %v1544_v4  ;;  %v260_v17 = vadd.f32 %v1026_v14, %v1522_v50  ;;  %v439_v11 = vld [vmem:[#allocation10 + $0x18] sm:$0xff]  ;;  %v437_v13 = vld [vmem:[#allocation10 + $0x8] sm:$0xff]  ;;  %v436_v14 = vld [vmem:[#allocation10] sm:$0xff] }
 0x130   :  { %v254_v18 = vpop.f32.mrf.mxu0 }
 0x131   :  { %315 = vst [vmem:[#allocation13 + $0x30] sm:$0xff] %v1558_v15  ;;  %v414_v19 = vadd.f32 %v413_v16, %v1558_v15  ;;  %v302_v20 = vmax.f32 %v260_v17, 0.0  ;;  %v255_v21 = vadd.f32 %v1522_v50, %v254_v18  ;;  %v666_v16 = vld [vmem:[#allocation12 + $0xf0] sm:$0xff]  ;;  %v665_v18 = vld [vmem:[#allocation12 + $0xe8] sm:$0xff] }
 0x132   :  { %v1029_v22 = vpop.f32.mrf.mxu0 }
 0x133   :  { %318 = vst [vmem:[#allocation13 + $0x48] sm:$0xff] %v302_v20  ;;  %v301_v23 = vmax.f32 %v255_v21, 0.0  ;;  %v415_v24 = vadd.f32 %v414_v19, %v1554_v12  ;;  %v270_v25 = vadd.f32 %v1029_v22, %v1522_v50  ;;  %v663_v21 = vld [vmem:[#allocation12 + $0xd8] sm:$0xff] }
 0x134   :  { %v264_v26 = vpop.f32.mrf.mxu0  ;;  %v651_v22 = vld [vmem:[#allocation12 + $0x78] sm:$0xff] }
 0x135   :  { %317 = vst [vmem:[#allocation13 + $0x40] sm:$0xff] %v301_v23  ;;  %v416_v27 = vadd.f32 %v415_v24, %v301_v23  ;;  %v304_v28 = vmax.f32 %v270_v25, 0.0  ;;  %v265_v29 = vadd.f32 %v1522_v50, %v264_v26  ;;  %v650_v24 = vld [vmem:[#allocation12 + $0x70] sm:$0xff]  ;;  %v649_v26 = vld [vmem:[#allocation12 + $0x68] sm:$0xff] }
 0x136   :  { %v1032_v30 = vpop.f32.mrf.mxu0 }
 0x137   :  { %320 = vst [vmem:[#allocation13 + $0x58] sm:$0xff] %v304_v28  ;;  %v303_v31 = vmax.f32 %v265_v29, 0.0  ;;  %v417_v33 = vadd.f32 %v416_v27, %v302_v20  ;;  %v280_v34 = vadd.f32 %v1032_v30, %v1522_v50  ;;  %v648_v27 = vld [vmem:[#allocation12 + $0x60] sm:$0xff]  ;;  %v646_v29 = vld [vmem:[#allocation12 + $0x50] sm:$0xff]  ;;  %v645_v30 = vld [vmem:[#allocation12 + $0x48] sm:$0xff] }
 0x138   :  { %v274_v35 = vpop.f32.mrf.mxu0 }
 0x139   :  { %319 = vst [vmem:[#allocation13 + $0x50] sm:$0xff] %v303_v31  ;;  %v418_v36 = vadd.f32 %v417_v33, %v303_v31  ;;  %v306_v37 = vmax.f32 %v280_v34, 0.0  ;;  %v275_v38 = vadd.f32 %v1522_v50, %v274_v35  ;;  %v643_v33 = vld [vmem:[#allocation12 + $0x38] sm:$0xff]  ;;  %v624_v34 = vld [vmem:[%s1677_s4] sm:$0x1] }
 0x13a   :  { %v1035_v39 = vpop.f32.mrf.mxu0  ;;  %v642_v35 = vld [vmem:[#allocation12 + $0x30] sm:$0xff] }
 0x13b   :  { %322 = vst [vmem:[#allocation13 + $0x68] sm:$0xff] %v306_v37  ;;  %v305_v40 = vmax.f32 %v275_v38, 0.0  ;;  %v419_v41 = vadd.f32 %v418_v36, %v304_v28  ;;  %v290_v42 = vadd.f32 %v1035_v39, %v1522_v50  ;;  %v641_v36 = vld [vmem:[#allocation12 + $0x28] sm:$0xff]  ;;  %v640_v38 = vld [vmem:[#allocation12 + $0x20] sm:$0xff]  ;;  %v639_v39 = vld [vmem:[#allocation12 + $0x18] sm:$0xff] }
 0x13c   :  { %v284_v43 = vpop.f32.mrf.mxu0 }
 0x13d   :  { %321 = vst [vmem:[#allocation13 + $0x60] sm:$0xff] %v305_v40  ;;  %v420_v44 = vadd.f32 %v419_v41, %v305_v40  ;;  %v308_v45 = vmax.f32 %v290_v42, 0.0  ;;  %v285_v46 = vadd.f32 %v1522_v50, %v284_v43  ;;  %v638_v42 = vld [vmem:[#allocation12 + $0x10] sm:$0xff]  ;;  %v637_v43 = vld [vmem:[#allocation12 + $0x8] sm:$0xff] }
 0x13e   :  { %v1617_v17 = vpop.f32.mrf.mxu0 }
 0x13f   :  { %324 = vst [vmem:[#allocation13 + $0x78] sm:$0xff] %v308_v45  ;;  %v307_v47 = vmax.f32 %v285_v46, 0.0  ;;  %v421_v48 = vadd.f32 %v420_v44, %v306_v37  ;;  %1037 = vmatpush3.msra.mxu1 %v308_v45 }
 0x140   :  { %1038 = vmatprep.subr.mxu1 %v1401_v32  ;;  %v1105_v19 = vpop.f32.mrf.mxu0 }
 0x141   :  { %323 = vst [vmem:[#allocation13 + $0x70] sm:$0xff] %v307_v47  ;;  %v422_v49 = vadd.f32 %v421_v48, %v307_v47  ;;  %1039 = vmatpush3.msra.mxu1 %v307_v47  ;;  %v662_v47 = vld [vmem:[#allocation12 + $0xd0] sm:$0xff]  ;;  %v661_v48 = vld [vmem:[#allocation12 + $0xc8] sm:$0xff] }
 0x142   :  { %1040 = vmatprep.subr.mxu1 %v1401_v32 }
 0x143   :  { %v423_v51 = vadd.f32 %v422_v49, %v308_v45  ;;  %1041 = vmatpush3.msra.mxu1 %v306_v37  ;;  %v625_v37 = vmax.f32 %v624_v34, 0.0  ;;  %v636_v45 = vld [vmem:[#allocation12] sm:$0xff] }
 0x144   :  { %1042 = vmatprep.subr.mxu1 %v1401_v32  ;;  %v660_v49 = vld [vmem:[#allocation12 + $0xc0] sm:$0xff] }
 0x145   :  { %v424_v52 = vrot.slane %v423_v51, 4  ;;  %1043 = vmatpush3.msra.mxu1 %v305_v40  ;;  %v626_v40 = vmul.f32 112.0, %v625_v37 }
 0x146   :  { %1044 = vmatprep.subr.mxu1 %v1401_v32 }
 0x147   :  { %v425_v50 = vadd.f32 %v424_v52, %v423_v51  ;;  %1045 = vmatpush3.msra.mxu1 %v304_v28  ;;  %v647_v28 = vld [vmem:[#allocation12 + $0x58] sm:$0xff]  ;;  %v658_v52 = vld [vmem:[#allocation12 + $0xb0] sm:$0xff] }
 0x148   :  { %1046 = vmatprep.subr.mxu1 %v1401_v32  ;;  %v659_v51 = vld [vmem:[#allocation12 + $0xb8] sm:$0xff] }
 0x149   :  { %v426_v53 = vrot.slane %v425_v50, 2  ;;  %1047 = vmatpush3.msra.mxu1 %v303_v31  ;;  %v644_v31 = vld [vmem:[#allocation12 + $0x40] sm:$0xff] }
 0x14a   :  { %1048 = vmatprep.subr.mxu1 %v1401_v32 }
 0x14b   :  { %v427_v55 = vadd.f32 %v426_v53, %v425_v50  ;;  %1049 = vmatpush3.msra.mxu1 %v302_v20  ;;  %v664_v20 = vld [vmem:[#allocation12 + $0xe0] sm:$0xff]  ;;  %v657_v50 = vld [vmem:[#allocation12 + $0xa8] sm:$0xff] }
 0x14c   :  { %1050 = vmatprep.subr.mxu1 %v1401_v32  ;;  %v656_v53 = vld [vmem:[#allocation12 + $0xa0] sm:$0xff] }
 0x14d   :  { %v428_v56 = vrot.slane %v427_v55, 1  ;;  %1051 = vmatpush3.msra.mxu1 %v301_v23 }
 0x14e   :  { %1052 = vmatprep.subr.mxu1 %v1401_v32 }
 0x14f   :  { %v429_v59 = vadd.f32 %v428_v56, %v427_v55  ;;  %1053 = vmatpush3.msra.mxu1 %v1554_v12  ;;  %v438_v12 = vld [vmem:[#allocation10 + $0x10] sm:$0xff]  ;;  %v655_v55 = vld [vmem:[#allocation12 + $0x98] sm:$0xff] }
 0x150   :  { %1054 = vmatprep.subr.mxu1 %v1401_v32  ;;  %v654_v56 = vld [vmem:[#allocation12 + $0x90] sm:$0xff] }
 0x151   :  { %v430_v61 = vadd.f32 %v429_v59, %v408_v58  ;;  %1055 = vmatpush3.msra.mxu1 %v1558_v15  ;;  %v667_v15 = vld [vmem:[#allocation12 + $0xf8] sm:$0xff]  ;;  %v653_v58 = vld [vmem:[#allocation12 + $0x88] sm:$0xff]  ;;  %v652_v59 = vld [vmem:[#allocation12 + $0x80] sm:$0xff] }
 0x152   :  { %1056 = vmatprep.subr.mxu1 %v1401_v32  ;;  %1142 = vmatpush3.msra.mxu0 %v667_v15 }
 0x153   :  { %431 = vst [vmem:[#allocation3] sm:$0x1] %v430_v61  ;;  %1057 = vmatpush3.msra.mxu1 %v1544_v4  ;;  %v446_v4 = vld [vmem:[#allocation10 + $0x50] sm:$0xff]  ;;  %1143 = vmatprep.subr.mxu0 %v1401_v32 }
 0x154   :  { %1058 = vmatprep.subr.mxu1 %v1401_v32  ;;  %1144 = vmatpush3.msra.mxu0 %v666_v16 }
 0x155   :  { %1059 = vmatpush3.msra.mxu1 %v1548_v7  ;;  %v443_v7 = vld [vmem:[#allocation10 + $0x38] sm:$0xff]  ;;  %1145 = vmatprep.subr.mxu0 %v1401_v32 }
 0x156   :  { %1060 = vmatprep.subr.mxu1 %v1401_v32  ;;  %1146 = vmatpush3.msra.mxu0 %v665_v18 }
 0x157   :  { %1061 = vmatpush3.msra.mxu1 %v1533_v60  ;;  %v1403_v60 = vmov 1.0   ;;  %1147 = vmatprep.subr.mxu0 %v1401_v32 }
 0x158   :  { %1062 = vmatprep.subr.mxu1 %v1401_v32  ;;  %1148 = vmatpush3.msra.mxu0 %v664_v20 }
 0x159   :  { %1063 = vmatpush3.msra.mxu1 %v1539_v0  ;;  %v449_v0 = vld [vmem:[#allocation10 + $0x68] sm:$0xff]  ;;  %1149 = vmatprep.subr.mxu0 %v1401_v32 }
 0x15a   :  { %1064 = vmatprep.subr.mxu1 %v1401_v32  ;;  %1150 = vmatpush3.msra.mxu0 %v663_v21  ;;  %v623_v41 = vld [vmem:[#allocation3] sm:$0x1] }
 0x15b   :  { %1065 = vmatpush3.msra.mxu1 %v1525_v54  ;;  %v448_v54 = vld [vmem:[#allocation10 + $0x60] sm:$0xff]  ;;  %1151 = vmatprep.subr.mxu0 %v1401_v32  ;;  %v627_v44 = vsub.f32 %v623_v41, %v626_v40 }
 0x15c   :  { %1066 = vmatprep.subr.mxu1 %v1401_v32  ;;  %1152 = vmatpush3.msra.mxu0 %v662_v47 }
 0x15d   :  { %1067 = vmatpush3.msra.mxu1 %v1529_v57  ;;  %v447_v57 = vld [vmem:[#allocation10 + $0x58] sm:$0xff]  ;;  %v628_v46 = vmul.f32 0.0625, %v627_v44  ;;  %1153 = vmatprep.subr.mxu0 %v1401_v32 }
 0x15e   :  { %1069 = vmatmul.mubr.msk.f32.vlgmr.msra.gmra.mxu1 %vm332_vm1, %v1403_v60  ;;  %1106 = vmatprep.subr.mxu1 %v1401_v32 }
 0x15f   :  { %1107 = vmatpush3.msra.mxu1 %v451_v2  ;;  %1138 = vmatprep.mubr.msk.f32.mxu1 %vm1402_vm0, %v1401_v32 }
 0x160   :  { %1108 = vmatprep.subr.mxu1 %v1401_v32  ;;  %1154 = vmatpush3.msra.mxu0 %v661_v48 }
 0x161   :  { %1109 = vmatpush3.msra.mxu1 %v450_v3  ;;  %1155 = vmatprep.subr.mxu0 %v1401_v32 }
 0x162   :  { %1110 = vmatprep.subr.mxu1 %v1401_v32  ;;  %1156 = vmatpush3.msra.mxu0 %v660_v49 }
 0x163   :  { %1111 = vmatpush3.msra.mxu1 %v449_v0  ;;  %1157 = vmatprep.subr.mxu0 %v1401_v32 }
 0x164   :  { %1112 = vmatprep.subr.mxu1 %v1401_v32  ;;  %1158 = vmatpush3.msra.mxu0 %v659_v51 }
 0x165   :  { %1113 = vmatpush3.msra.mxu1 %v448_v54  ;;  %1159 = vmatprep.subr.mxu0 %v1401_v32 }
 0x166   :  { %1114 = vmatprep.subr.mxu1 %v1401_v32  ;;  %1160 = vmatpush3.msra.mxu0 %v658_v52 }
 0x167   :  { %1115 = vmatpush3.msra.mxu1 %v447_v57  ;;  %1161 = vmatprep.subr.mxu0 %v1401_v32 }
 0x168   :  { %1116 = vmatprep.subr.mxu1 %v1401_v32  ;;  %1162 = vmatpush3.msra.mxu0 %v657_v50 }
 0x169   :  { %1117 = vmatpush3.msra.mxu1 %v446_v4  ;;  %1163 = vmatprep.subr.mxu0 %v1401_v32 }
 0x16a   :  { %1118 = vmatprep.subr.mxu1 %v1401_v32  ;;  %1164 = vmatpush3.msra.mxu0 %v656_v53 }
 0x16b   :  { %1119 = vmatpush3.msra.mxu1 %v445_v5  ;;  %1165 = vmatprep.subr.mxu0 %v1401_v32 }
 0x16c   :  { %1120 = vmatprep.subr.mxu1 %v1401_v32  ;;  %1166 = vmatpush3.msra.mxu0 %v655_v55 }
 0x16d   :  { %1121 = vmatpush3.msra.mxu1 %v444_v6  ;;  %1167 = vmatprep.subr.mxu0 %v1401_v32 }
 0x16e   :  { %1122 = vmatprep.subr.mxu1 %v1401_v32  ;;  %1168 = vmatpush3.msra.mxu0 %v654_v56 }
 0x16f   :  { %1123 = vmatpush3.msra.mxu1 %v443_v7  ;;  %1169 = vmatprep.subr.mxu0 %v1401_v32 }
 0x170   :  { %1124 = vmatprep.subr.mxu1 %v1401_v32  ;;  %1170 = vmatpush3.msra.mxu0 %v653_v58 }
 0x171   :  { %1125 = vmatpush3.msra.mxu1 %v442_v8  ;;  %1171 = vmatprep.subr.mxu0 %v1401_v32 }
 0x172   :  { %1126 = vmatprep.subr.mxu1 %v1401_v32  ;;  %1172 = vmatpush3.msra.mxu0 %v652_v59 }
 0x173   :  { %1127 = vmatpush3.msra.mxu1 %v441_v9 }
 0x174   :  { %1128 = vmatprep.subr.mxu1 %v1401_v32 }
 0x175   :  { %1129 = vmatpush3.msra.mxu1 %v440_v10 }
 0x176   :  { %1130 = vmatprep.subr.mxu1 %v1401_v32 }
 0x177   :  { %1131 = vmatpush3.msra.mxu1 %v439_v11 }
 0x178   :  { %1132 = vmatprep.subr.mxu1 %v1401_v32 }
 0x179   :  { %1133 = vmatpush3.msra.mxu1 %v438_v12 }
 0x17a   :  { %1134 = vmatprep.subr.mxu1 %v1401_v32 }
 0x17b   :  { %1135 = vmatpush3.msra.mxu1 %v437_v13 }
 0x17c   :  { %1136 = vmatprep.subr.mxu1 %v1401_v32 }
 0x17d   :  { %1137 = vmatpush3.msra.mxu1 %v436_v14 }
 0x17e   :  { %1176 = vmatprep.subr.mxu1 %v1401_v32 }
 0x21e   :  { %v402_v23 = vpop.f32.mrf.mxu1 }
 0x21f   :  { %1139 = vmatmul.mubr.f32.vlgmr.msra.gmra.mxu1 %v402_v23 }
 0x220   :  { %1177 = vmatpush3.msra.mxu1 %v651_v22  ;;  %v1070_v25 = vpop.f32.mrf.mxu1  ;;  %1208 = vmatprep.mubr.msk.f32.mxu1 %vm1402_vm0, %v1401_v32 }
 0x221   :  { %1178 = vmatprep.subr.mxu1 %v1401_v32 }
 0x222   :  { %1179 = vmatpush3.msra.mxu1 %v650_v24 }
 0x223   :  { %1180 = vmatprep.subr.mxu1 %v1401_v32 }
 0x224   :  { %1181 = vmatpush3.msra.mxu1 %v649_v26 }
 0x225   :  { %1182 = vmatprep.subr.mxu1 %v1401_v32 }
 0x226   :  { %1183 = vmatpush3.msra.mxu1 %v648_v27 }
 0x227   :  { %1184 = vmatprep.subr.mxu1 %v1401_v32 }
 0x228   :  { %1185 = vmatpush3.msra.mxu1 %v647_v28 }
 0x229   :  { %1186 = vmatprep.subr.mxu1 %v1401_v32 }
 0x22a   :  { %1187 = vmatpush3.msra.mxu1 %v646_v29 }
 0x22b   :  { %1188 = vmatprep.subr.mxu1 %v1401_v32 }
 0x22c   :  { %1189 = vmatpush3.msra.mxu1 %v645_v30 }
 0x22d   :  { %1190 = vmatprep.subr.mxu1 %v1401_v32 }
 0x22e   :  { %1191 = vmatpush3.msra.mxu1 %v644_v31 }
 0x22f   :  { %1192 = vmatprep.subr.mxu1 %v1401_v32 }
 0x230   :  { %1193 = vmatpush3.msra.mxu1 %v643_v33 }
 0x231   :  { %1194 = vmatprep.subr.mxu1 %v1401_v32 }
 0x232   :  { %1195 = vmatpush3.msra.mxu1 %v642_v35 }
 0x233   :  { %1196 = vmatprep.subr.mxu1 %v1401_v32 }
 0x234   :  { %1197 = vmatpush3.msra.mxu1 %v641_v36 }
 0x235   :  { %1198 = vmatprep.subr.mxu1 %v1401_v32 }
 0x236   :  { %1199 = vmatpush3.msra.mxu1 %v640_v38 }
 0x237   :  { %1200 = vmatprep.subr.mxu1 %v1401_v32 }
 0x238   :  { %1201 = vmatpush3.msra.mxu1 %v639_v39 }
 0x239   :  { %1202 = vmatprep.subr.mxu1 %v1401_v32 }
 0x23a   :  { %1203 = vmatpush3.msra.mxu1 %v638_v42 }
 0x23b   :  { %1204 = vmatprep.subr.mxu1 %v1401_v32 }
 0x23c   :  { %1205 = vmatpush3.msra.mxu1 %v637_v43 }
 0x23d   :  { %1206 = vmatprep.subr.mxu1 %v1401_v32 }
 0x23e   :  { %1207 = vmatpush3.msra.mxu1 %v636_v45 }
 0x23f   :  { %1209 = vmatmul.mubr.f32.vlgmr.msra.gmra.mxu1 %v628_v46 }
 0x2df   :  { %v605_v61 = vpop.f32.mrf.mxu1 }
 0x2e0   :  { %v606_v63 = vadd.f32 %v605_v61, %v1617_v17 }
 0x2e1   :  { %v1140_v1 = vpop.f32.mrf.mxu1 }
 0x2e2   :  { %v616_v2 = vadd.f32 %v862_v62, %v606_v63 }
 0x2e4   :  { %v617_v60 = vmax.f32 %v616_v2, 0.0 }
 0x2e6   :  { %v629_v3 = vrot.slane %v617_v60, 4  ;;  %622 = vst [vmem:[#allocation14] sm:$0xff] %v617_v60 }
 0x2e8   :  { %v630_v0 = vadd.f32 %v629_v3, %v617_v60 }
 0x2ea   :  { %v631_v54 = vrot.slane %v630_v0, 2 }
 0x2ec   :  { %v632_v57 = vadd.f32 %v631_v54, %v630_v0 }
 0x2ee   :  { %v633_v4 = vrot.slane %v632_v57, 1 }
 0x2f0   :  { %v634_v5 = vadd.f32 %v633_v4, %v632_v57 }
 0x2f2   :  { %v635_v6 = vmul.f32 0.125, %v634_v5 }
 0x2f4   :  { %1174 = vmatmul.mubr.f32.vlgmr.msra.gmra.mxu0 %v635_v6 }
 0x2ff   :  { %v804_v32 = vpop.f32.mrf.mxu1 }
 0x301   :  { %v1210_v7 = vpop.f32.mrf.mxu1 }
 0x302   :  { %1335 = shalt.err (!%p1332_p1)
}
 0x303   :  { %833 = dma.vmem_to_hbm [thread:$0]  %s831_s29, 128, %s1683_s10, [#allocation15]  }
 0x304   :  { %s1344_s14 = scalar_lea.vmem %s818_s30, 2048  ;;  %p1349_p3 = scmp.lt.s32.totalorder %s818_s30, %s818_s30 }
 0x305   :  { %p1345_p2 = scmp.ne.s32.totalorder %s818_s30, %s1344_s14  ;;  %p1350_p4 = scmp.lt.s32.totalorder %s1344_s14, %s1344_s14 }
 0x307   :  { %p1351_p5 = por %p1350_p4, %p1349_p3 }
 0x309   :  { %p1352_p6 = pnand %p1351_p5, %p1345_p2 }
 0x30b   :  { %1355 = shalt.err (!%p1352_p6)
}
 0x30c   :  { %823 = dma.vmem_to_hbm [thread:$0]  %s818_s30, 2048, %s1682_s9, [#allocation6], %s1397_s27, %s1397_s27, %s1398_s28  }
 0x30d   :  { %v808_v9 = vld [vmem:[%s1681_s8] sm:$0x1]  ;;  %s1406_s10 = smov [#allocation16]  }
 0x30e   :  { %s840_s18 = sshll.u32 %s1406_s10, 4  ;;  %s841_s18 = int_to_ptr.vmem [resolvable:$true] %s840_s18 }
 0x30f   :  { %s1364_s19 = scalar_lea.vmem %s841_s18, 16  ;;  %s1368_s0 = scalar_lea.vmem %s841_s18, 32 }
 0x310   :  { %p1365_p7 = scmp.ne.s32.totalorder %s841_s18, %s1364_s19  ;;  %p1369_p8 = scmp.lt.s32.totalorder %s841_s18, %s841_s18 }
 0x311   :  { %p1370_p9 = scmp.lt.s32.totalorder %s1368_s0, %s1364_s19 }
 0x313   :  { %p1371_p10 = por %p1370_p9, %p1369_p8 }
 0x315   :  { %p1372_p11 = pnand %p1371_p10, %p1365_p7 }
 0x3b4   :  { %v734_v8 = vpop.f32.mrf.mxu0 }
 0x3b5   :  { %v805_v10 = vadd.f32 %v804_v32, %v734_v8 }
 0x3b6   :  { %v1175_v11 = vpop.f32.mrf.mxu0 }
 0x3b7   :  { %v809_v12 = vadd.f32 %v808_v9, %v805_v10 }
 0x3b9   :  { %v810_v13 = vmax.f32 %v809_v12, 0.0 }
 0x3bb   :  { %811 = vst [vmem:[#allocation16] sm:$0x1] %v810_v13 }
 0x3bc   :  { %1375 = shalt.err (!%p1372_p11)
}
 0x3bd   :  { %843 = dma.vmem_to_hbm [thread:$0]  %s841_s18, 16, %s1684_s11, [#allocation15]  }
 0x3be   :  { %1390 = dma.done.wait [#allocation6], 2048  }
 0x3bf   :  { %1391 = vsyncadd [#allocation6], 4294965248 }
 0x3c0   :  { %1392 = dma.done.wait [#allocation15], 144  }
 0x3c1   :  { %1393 = vsyncadd [#allocation15], 4294967152 }
 0x3c2   :  { %853 = vsyncpa [#allocation5], 1 }
 0x3c3   :  { %854 = vsyncpa [#allocation8], 1 }
 0x3c4   :  { %855 = vsyncpa [#allocation11], 1 }
 0x3c5   :  { %856 = vsyncpa [#allocation6], 1 }
 0x3c6   :  { %857 = vsyncpa [#allocation15], 1 }

</bundles_post_ra>
